<compile_context>
chip_gen: v5e
topology: v5e:2x2
jax: 0.10.0
libtpu: 0.0.40
codegen_flags: <defaults>
</compile_context>

<pallas_src>
import functools

import jax
import jax.numpy as jnp
from jax.experimental import pallas as pl
from jax.experimental.pallas import tpu as pltpu

LN_EPS = 1e-5  # nn.LayerNorm default


def _round_up(a: int, b: int) -> int:
    return (a + b - 1) // b * b


def _vmem_budget() -> int:
    """~80% of per-core VMEM: ~51 MiB on v7x (64 MiB), ~102 MiB on v5e/v6e."""
    cap = 64 * 1024 * 1024  # conservative fallback (safe on every generation)
    try:
        info = pltpu.get_tpu_info()
        cap = int(getattr(info, "vmem_capacity_bytes", cap)) or cap
    except Exception:
        pass
    return int(cap * 0.80)


def _pick_tk(d_inner: int, max_tk: int = 512) -> int:
    """Chunk width for the hidden dim (chunked fallback only). Prefer 512/256
    (keeps the 2x256x256 MXUs of v6e/v7x full); 128 only as last resort."""
    if d_inner <= max_tk:
        return d_inner
    for c in (512, 256, 128):
        if c <= max_tk and d_inner % c == 0:
            return c
    return d_inner  # irregular size: single full-width chunk


def _layer_norm_f32(x_f32, gamma_f32, beta_f32):
    mu = jnp.mean(x_f32, axis=-1, keepdims=True)
    var = jnp.mean(jnp.square(x_f32 - mu), axis=-1, keepdims=True)
    return (x_f32 - mu) * jax.lax.rsqrt(var + LN_EPS) * gamma_f32 + beta_f32


def _mxu_precision(w_dtype):
    # f32 weights -> exact f32 MXU path (matches PyTorch f32 math);
    # narrow weights -> default (fast bf16/int8 path).
    return jax.lax.Precision.HIGHEST if jnp.dtype(w_dtype) == jnp.float32 else None


# ----------------------------------------------------------------------------
# Fast path: W1/W2 fully VMEM-resident, single ("parallel") grid axis.
# ----------------------------------------------------------------------------
def _ff_kernel_resident(x_ref, g_ref, b_ref, w1_ref, b1_ref, w2_ref, b2_ref,
                        o_ref, *, pre_lnorm: bool):
    prec = _mxu_precision(w1_ref.dtype)
    g32 = g_ref[...].astype(jnp.float32)
    b32 = b_ref[...].astype(jnp.float32)

    if pre_lnorm:
        xn = _layer_norm_f32(x_ref[...].astype(jnp.float32), g32, b32)
        core_in = xn.astype(w1_ref.dtype)
    else:
        core_in = x_ref[...].astype(w1_ref.dtype)

    h = jnp.dot(core_in, w1_ref[...],
                preferred_element_type=jnp.float32, precision=prec)
    h = jnp.maximum(h + b1_ref[...].astype(jnp.float32), 0.0)

    out = jnp.dot(h.astype(w2_ref.dtype), w2_ref[...],
                  preferred_element_type=jnp.float32, precision=prec)
    out = out + b2_ref[...].astype(jnp.float32)

    if not pre_lnorm:
        out = _layer_norm_f32(out, g32, b32)

    o_ref[...] = out.astype(o_ref.dtype)
    # TODO(synk): dropout omitted (inference / eval semantics => identity).


# ----------------------------------------------------------------------------
# Fallback path: d_inner streamed in chunks over an "arbitrary" axis.
# ----------------------------------------------------------------------------
def _ff_kernel_chunked(x_ref, g_ref, b_ref, w1_ref, b1_ref, w2_ref, b2_ref,
                       o_ref, *scratch, pre_lnorm: bool, acc_in_out: bool):
    k = pl.program_id(1)
    nk = pl.num_programs(1)
    prec = _mxu_precision(w1_ref.dtype)

    if acc_in_out:                 # f32 output: accumulate directly in o_ref
        acc_ref, rest = o_ref, scratch
    else:                          # narrow output: f32 scratch accumulator
        acc_ref, rest = scratch[0], scratch[1:]
    xin_ref = rest[0] if pre_lnorm else None

    @pl.when(k == 0)
    def _init():
        acc_ref[...] = jnp.zeros_like(acc_ref)
        if pre_lnorm:
            # LayerNorm once per row tile (f32), cached in the weight dtype so
            # every chunk's matmul consumes MXU-ready operands.
            xn = _layer_norm_f32(x_ref[...].astype(jnp.float32),
                                 g_ref[...].astype(jnp.float32),
                                 b_ref[...].astype(jnp.float32))
            xin_ref[...] = xn.astype(xin_ref.dtype)

    core_in = xin_ref[...] if pre_lnorm else x_ref[...].astype(w1_ref.dtype)

    h = jnp.dot(core_in, w1_ref[...],
                preferred_element_type=jnp.float32, precision=prec)
    h = jnp.maximum(h + b1_ref[...].astype(jnp.float32), 0.0)

    acc_ref[...] += jnp.dot(h.astype(w2_ref.dtype), w2_ref[...],
                            preferred_element_type=jnp.float32,
                            precision=prec).astype(acc_ref.dtype)

    @pl.when(k == nk - 1)
    def _finalize():
        out = acc_ref[...].astype(jnp.float32) + b2_ref[...].astype(jnp.float32)
        if not pre_lnorm:
            out = _layer_norm_f32(out, g_ref[...].astype(jnp.float32),
                                  b_ref[...].astype(jnp.float32))
        o_ref[...] = out.astype(o_ref.dtype)
    # TODO(synk): dropout omitted (inference / eval semantics => identity).


# ----------------------------------------------------------------------------
# Wrapper
# ----------------------------------------------------------------------------
def positionwise_ff(x, params, *, pre_lnorm: bool, tm: int = 512,
                    max_tk: int = 512, force_chunked: bool = False):
    """x: (seq, batch, d_model). Returns the same shape and dtype."""
    seq, batch, d_model = x.shape
    d_inner = params["w1"].shape[1]
    n = seq * batch

    x_isz = jnp.dtype(x.dtype).itemsize
    w_isz = jnp.dtype(params["w1"].dtype).itemsize
    out_isz = x_isz

    # Dtype-aware sublane alignment: 8 (f32), 16 (bf16), 32 (int8/fp8).
    row_align = 8 * max(1, 4 // x_isz)

    # Row tiling: big tile, aligned, capped to the (padded) row count.
    tm_eff = _round_up(max(row_align, min(tm, _round_up(n, row_align))), row_align)
    n_pad = _round_up(n, tm_eff)
    grid_m = n_pad // tm_eff
    # Make sure the "parallel" row axis has >= 2 tiles when possible, so it
    # can shard across both v7x TensorCores (harmless elsewhere).
    if grid_m == 1 and tm_eff >= 2 * row_align:
        tm_eff = _round_up(tm_eff // 2, row_align)
        n_pad = _round_up(n, tm_eff)
        grid_m = n_pad // tm_eff

    x2d = x.reshape(n, d_model)
    if n_pad != n:
        x2d = jnp.pad(x2d, ((0, n_pad - n), (0, 0)))

    budget = _vmem_budget()
    w_bytes = 2 * d_model * d_inner * w_isz                 # W1 + W2
    bias_bytes = (3 * d_model + d_inner) * w_isz            # gamma/beta/b1/b2

    # VMEM needed if W1/W2 are kept resident (tiles counted double-buffered).
    resident_need = (2 * tm_eff * d_model * x_isz           # x tiles
                     + 2 * tm_eff * d_model * out_isz       # out tiles
                     + 2 * w_bytes                          # weights (x2, safe)
                     + 2 * bias_bytes
                     + tm_eff * d_inner * 4                 # h intermediate (f32)
                     + tm_eff * d_model * 4)                # f32 epilogue headroom

    use_resident = (not force_chunked) and (resident_need <= budget)
    flops = int(4 * n_pad * d_model * d_inner)

    args = (x2d, params["ln_gamma"], params["ln_beta"],
            params["w1"], params["b1"], params["w2"], params["b2"])

    if use_resident:
        vmem_limit = int(min(budget, max(resident_need + (4 << 20), 32 << 20)))
        cost = pl.CostEstimate(
            flops=flops,
            transcendentals=int(n_pad),
            bytes_accessed=int(2 * n_pad * d_model * x_isz + w_bytes + bias_bytes),
        )
        out2d = pl.pallas_call(
            functools.partial(_ff_kernel_resident, pre_lnorm=pre_lnorm),
            out_shape=jax.ShapeDtypeStruct((n_pad, d_model), x.dtype),
            grid_spec=pltpu.PrefetchScalarGridSpec(
                num_scalar_prefetch=0,
                grid=(grid_m,),
                in_specs=[
                    pl.BlockSpec((tm_eff, d_model), lambda i: (i, 0)),     # x rows
                    pl.BlockSpec((1, d_model), lambda i: (0, 0)),          # gamma
                    pl.BlockSpec((1, d_model), lambda i: (0, 0)),          # beta
                    pl.BlockSpec((d_model, d_inner), lambda i: (0, 0)),    # W1 (resident)
                    pl.BlockSpec((1, d_inner), lambda i: (0, 0)),          # b1
                    pl.BlockSpec((d_inner, d_model), lambda i: (0, 0)),    # W2 (resident)
                    pl.BlockSpec((1, d_model), lambda i: (0, 0)),          # b2
                ],
                out_specs=pl.BlockSpec((tm_eff, d_model), lambda i: (i, 0)),
            ),
            compiler_params=pltpu.CompilerParams(
                dimension_semantics=("parallel",),
                vmem_limit_bytes=vmem_limit,
            ),
            cost_estimate=cost,
        )(*args)
        return out2d[:n].reshape(seq, batch, d_model)

    # ---------------- chunked fallback (very large d_inner) ----------------
    tk = _pick_tk(d_inner, max_tk)
    nk = d_inner // tk
    acc_in_out = jnp.dtype(x.dtype) == jnp.float32   # accumulate directly in o_ref

    scratch_shapes = []
    if not acc_in_out:
        scratch_shapes.append(pltpu.VMEM((tm_eff, d_model), jnp.float32))
    if pre_lnorm:
        scratch_shapes.append(pltpu.VMEM((tm_eff, d_model), params["w1"].dtype))

    needed = (2 * tm_eff * d_model * x_isz            # x tiles
              + 2 * tm_eff * d_model * out_isz        # out tiles
              + 2 * d_model * tk * w_isz              # W1 column chunks
              + 2 * tk * d_model * w_isz              # W2 row chunks
              + 2 * bias_bytes
              + (0 if acc_in_out else tm_eff * d_model * 4)
              + (tm_eff * d_model * w_isz if pre_lnorm else 0)
              + tm_eff * tk * 4)                      # h intermediate
    vmem_limit = int(min(budget, max(needed + (4 << 20), 32 << 20)))

    cost = pl.CostEstimate(
        flops=flops,
        transcendentals=int(n_pad),
        bytes_accessed=int(2 * n_pad * d_model * x_isz
                           + grid_m * w_bytes + bias_bytes),
    )

    # TODO(synk): if profiling shows exposed DMA on the strided W1 column
    # chunks, pre-transpose W1 in the wrapper or raise pl.Buffered(3) on it.
    out2d = pl.pallas_call(
        functools.partial(_ff_kernel_chunked, pre_lnorm=pre_lnorm,
                          acc_in_out=acc_in_out),
        out_shape=jax.ShapeDtypeStruct((n_pad, d_model), x.dtype),
        grid_spec=pltpu.PrefetchScalarGridSpec(
            num_scalar_prefetch=0,
            grid=(grid_m, nk),
            in_specs=[
                pl.BlockSpec((tm_eff, d_model), lambda i, k: (i, 0)),   # x rows
                pl.BlockSpec((1, d_model), lambda i, k: (0, 0)),        # gamma
                pl.BlockSpec((1, d_model), lambda i, k: (0, 0)),        # beta
                pl.BlockSpec((d_model, tk), lambda i, k: (0, k)),       # W1 chunk
                pl.BlockSpec((1, tk), lambda i, k: (0, k)),             # b1 chunk
                pl.BlockSpec((tk, d_model), lambda i, k: (k, 0)),       # W2 chunk
                pl.BlockSpec((1, d_model), lambda i, k: (0, 0)),        # b2
            ],
            out_specs=pl.BlockSpec((tm_eff, d_model), lambda i, k: (i, 0)),
            scratch_shapes=scratch_shapes,
        ),
        compiler_params=pltpu.CompilerParams(
            dimension_semantics=("parallel", "arbitrary"),
            vmem_limit_bytes=vmem_limit,
        ),
        cost_estimate=cost,
    )(*args)
    return out2d[:n].reshape(seq, batch, d_model)


# ----------------------------------------------------------------------------
# Pure-JAX reference + params
# ----------------------------------------------------------------------------
def _reference(x, params, *, pre_lnorm: bool):
    x = x.astype(jnp.float32)
    g = params["ln_gamma"].astype(jnp.float32)
    b = params["ln_beta"].astype(jnp.float32)
    hi = jax.lax.Precision.HIGHEST

    def ln(v):
        mu = jnp.mean(v, axis=-1, keepdims=True)
        var = jnp.mean((v - mu) ** 2, axis=-1, keepdims=True)
        return (v - mu) / jnp.sqrt(var + LN_EPS) * g + b

    def core(v):
        h = jnp.maximum(
            jnp.dot(v, params["w1"].astype(jnp.float32), precision=hi)
            + params["b1"].astype(jnp.float32), 0.0)
        return (jnp.dot(h, params["w2"].astype(jnp.float32), precision=hi)
                + params["b2"].astype(jnp.float32))

    return core(ln(x)) if pre_lnorm else ln(core(x))


def init_params(key, d_model, d_inner, dtype=jnp.float32):
    k1, k2, k3, k4 = jax.random.split(key, 4)
    s1 = 1.0 / jnp.sqrt(d_model)
    s2 = 1.0 / jnp.sqrt(d_inner)
    return {
        "w1": (jax.random.normal(k1, (d_model, d_inner), jnp.float32) * s1).astype(dtype),
        "b1": (jax.random.normal(k2, (1, d_inner), jnp.float32) * 0.01).astype(dtype),
        "w2": (jax.random.normal(k3, (d_inner, d_model), jnp.float32) * s2).astype(dtype),
        "b2": (jax.random.normal(k4, (1, d_model), jnp.float32) * 0.01).astype(dtype),
        "ln_gamma": jnp.ones((1, d_model), dtype),
        "ln_beta": jnp.zeros((1, d_model), dtype),
    }


if __name__ == "__main__":
    # Small but lane-aligned shapes (d_model multiple of 128).
    seq, batch, d_model, d_inner = 8, 2, 128, 256
    key = jax.random.PRNGKey(0)
    kx, kp = jax.random.split(key)

    x = jax.random.normal(kx, (seq, batch, d_model), jnp.float32)
    params = init_params(kp, d_model, d_inner, jnp.float32)

    ok = True
    for pre_lnorm in (True, False):
        # Resident-weight fast path.
        out = jax.block_until_ready(positionwise_ff(x, params, pre_lnorm=pre_lnorm))
        ref = _reference(x, params, pre_lnorm=pre_lnorm)
        if not jnp.allclose(out.astype(jnp.float32), ref, atol=1e-3, rtol=1e-3):
            ok = False
        # Chunked fallback path (forced, tk=128 -> 2 chunks) to exercise it too.
        out_c = jax.block_until_ready(
            positionwise_ff(x, params, pre_lnorm=pre_lnorm,
                            force_chunked=True, max_tk=128))
        if not jnp.allclose(out_c.astype(jnp.float32), ref, atol=1e-3, rtol=1e-3):
            ok = False

    print("KERNEL_OK" if ok else "KERNEL_MISMATCH")
</pallas_src>

<mosaic_0001>
module attributes {stable_mosaic.version = 11 : i64} {
  func.func @_ff_kernel_resident(%arg0: i32, %arg1: memref<8x128xf32, #tpu.memory_space<vmem>>, %arg2: memref<1x128xf32, #tpu.memory_space<vmem>>, %arg3: memref<1x128xf32, #tpu.memory_space<vmem>>, %arg4: memref<128x256xf32, #tpu.memory_space<vmem>>, %arg5: memref<1x256xf32, #tpu.memory_space<vmem>>, %arg6: memref<256x128xf32, #tpu.memory_space<vmem>>, %arg7: memref<1x128xf32, #tpu.memory_space<vmem>>, %arg8: memref<8x128xf32, #tpu.memory_space<vmem>>) attributes {dimension_semantics = [#tpu.dimension_semantics<parallel>], iteration_bounds = array<i64: 2>, scalar_prefetch = 0 : i64, scratch_operands = 0 : i64, tpu.core_type = #tpu.core_type<tc>, window_params = [{transform_indices = @transform_0, window_bounds = array<i64: 8, 128>}, {pipeline_mode = #tpu.pipeline_mode<synchronous>, transform_indices = @transform_1, window_bounds = array<i64: 1, 128>}, {pipeline_mode = #tpu.pipeline_mode<synchronous>, transform_indices = @transform_2, window_bounds = array<i64: 1, 128>}, {pipeline_mode = #tpu.pipeline_mode<synchronous>, transform_indices = @transform_3, window_bounds = array<i64: 128, 256>}, {pipeline_mode = #tpu.pipeline_mode<synchronous>, transform_indices = @transform_4, window_bounds = array<i64: 1, 256>}, {pipeline_mode = #tpu.pipeline_mode<synchronous>, transform_indices = @transform_5, window_bounds = array<i64: 256, 128>}, {pipeline_mode = #tpu.pipeline_mode<synchronous>, transform_indices = @transform_6, window_bounds = array<i64: 1, 128>}, {transform_indices = @transform_7, window_bounds = array<i64: 8, 128>}]} {
    %c0 = arith.constant 0 : index
    %c0_0 = arith.constant 0 : index
    %0 = vector.load %arg2[%c0, %c0_0] : memref<1x128xf32, #tpu.memory_space<vmem>>, vector<1x128xf32>
    %c0_1 = arith.constant 0 : index
    %c0_2 = arith.constant 0 : index
    %1 = vector.load %arg3[%c0_1, %c0_2] : memref<1x128xf32, #tpu.memory_space<vmem>>, vector<1x128xf32>
    %c0_3 = arith.constant 0 : index
    %c0_4 = arith.constant 0 : index
    %2 = vector.load %arg1[%c0_3, %c0_4] : memref<8x128xf32, #tpu.memory_space<vmem>>, vector<8x128xf32>
    %cst = arith.constant dense<0.000000e+00> : vector<8xf32>
    %3 = vector.multi_reduction <add>, %2, %cst [1] : vector<8x128xf32> to vector<8xf32>
    %4 = vector.shape_cast %3 : vector<8xf32> to vector<8x1xf32>
    %cst_5 = arith.constant 1.280000e+02 : f32
    %5 = vector.broadcast %cst_5 : f32 to vector<8x1xf32>
    %6 = arith.divf %4, %5 : vector<8x1xf32>
    %7 = vector.broadcast %6 : vector<8x1xf32> to vector<8x128xf32>
    %8 = arith.subf %2, %7 : vector<8x128xf32>
    %9 = arith.mulf %8, %8 : vector<8x128xf32>
    %cst_6 = arith.constant dense<0.000000e+00> : vector<8xf32>
    %10 = vector.multi_reduction <add>, %9, %cst_6 [1] : vector<8x128xf32> to vector<8xf32>
    %11 = vector.shape_cast %10 : vector<8xf32> to vector<8x1xf32>
    %cst_7 = arith.constant 1.280000e+02 : f32
    %12 = vector.broadcast %cst_7 : f32 to vector<8x1xf32>
    %13 = arith.divf %11, %12 : vector<8x1xf32>
    %14 = vector.broadcast %6 : vector<8x1xf32> to vector<8x128xf32>
    %15 = arith.subf %2, %14 : vector<8x128xf32>
    %cst_8 = arith.constant 9.99999974E-6 : f32
    %16 = vector.broadcast %cst_8 : f32 to vector<8x1xf32>
    %17 = arith.addf %13, %16 : vector<8x1xf32>
    %18 = math.rsqrt %17 : vector<8x1xf32>
    %19 = vector.broadcast %18 : vector<8x1xf32> to vector<8x128xf32>
    %20 = arith.mulf %15, %19 : vector<8x128xf32>
    %21 = vector.broadcast %0 : vector<1x128xf32> to vector<8x128xf32>
    %22 = arith.mulf %20, %21 : vector<8x128xf32>
    %23 = vector.broadcast %1 : vector<1x128xf32> to vector<8x128xf32>
    %24 = arith.addf %22, %23 : vector<8x128xf32>
    %c0_9 = arith.constant 0 : index
    %c0_10 = arith.constant 0 : index
    %25 = vector.load %arg4[%c0_9, %c0_10] : memref<128x256xf32, #tpu.memory_space<vmem>>, vector<128x256xf32>
    %cst_11 = arith.constant dense<0.000000e+00> : vector<8x256xf32>
    %26 = tpu.matmul %24, %25, %cst_11 {dimension_numbers = #tpu.dot_dimension_numbers<[1], [0], [0], [1], [0, 0, 1, 1], [], []>, precision = #tpu.contract_precision<fp32>} : vector<8x128xf32>, vector<128x256xf32>, vector<8x256xf32> -> vector<8x256xf32>
    %c0_12 = arith.constant 0 : index
    %c0_13 = arith.constant 0 : index
    %27 = vector.load %arg5[%c0_12, %c0_13] : memref<1x256xf32, #tpu.memory_space<vmem>>, vector<1x256xf32>
    %28 = vector.broadcast %27 : vector<1x256xf32> to vector<8x256xf32>
    %29 = arith.addf %26, %28 : vector<8x256xf32>
    %cst_14 = arith.constant 0.000000e+00 : f32
    %30 = vector.broadcast %cst_14 : f32 to vector<8x256xf32>
    %31 = arith.maximumf %29, %30 : vector<8x256xf32>
    %c0_15 = arith.constant 0 : index
    %c0_16 = arith.constant 0 : index
    %32 = vector.load %arg6[%c0_15, %c0_16] : memref<256x128xf32, #tpu.memory_space<vmem>>, vector<256x128xf32>
    %cst_17 = arith.constant dense<0.000000e+00> : vector<8x128xf32>
    %33 = tpu.matmul %31, %32, %cst_17 {dimension_numbers = #tpu.dot_dimension_numbers<[1], [0], [0], [1], [0, 0, 1, 1], [], []>, precision = #tpu.contract_precision<fp32>} : vector<8x256xf32>, vector<256x128xf32>, vector<8x128xf32> -> vector<8x128xf32>
    %c0_18 = arith.constant 0 : index
    %c0_19 = arith.constant 0 : index
    %34 = vector.load %arg7[%c0_18, %c0_19] : memref<1x128xf32, #tpu.memory_space<vmem>>, vector<1x128xf32>
    %35 = vector.broadcast %34 : vector<1x128xf32> to vector<8x128xf32>
    %36 = arith.addf %33, %35 : vector<8x128xf32>
    %c0_20 = arith.constant 0 : index
    %c0_21 = arith.constant 0 : index
    %37 = vector.load %arg8[%c0_20, %c0_21] : memref<8x128xf32, #tpu.memory_space<vmem>>, vector<8x128xf32>
    tpu.vector_store %arg8[%c0_20, %c0_21], %36 {strides = array<i32>} : memref<8x128xf32, #tpu.memory_space<vmem>>, vector<8x128xf32>,
    return
  }
  func.func @transform_0(%arg0: i32) -> (i32, i32) {
    %c0_i32 = arith.constant 0 : i32
    %c0_i32_0 = arith.constant 0 : i32
    return %arg0, %c0_i32 : i32, i32
  }
  func.func @transform_1(%arg0: i32) -> (i32, i32) {
    %c0_i32 = arith.constant 0 : i32
    %c0_i32_0 = arith.constant 0 : i32
    %c0_i32_1 = arith.constant 0 : i32
    return %c0_i32, %c0_i32_0 : i32, i32
  }
  func.func @transform_2(%arg0: i32) -> (i32, i32) {
    %c0_i32 = arith.constant 0 : i32
    %c0_i32_0 = arith.constant 0 : i32
    %c0_i32_1 = arith.constant 0 : i32
    return %c0_i32, %c0_i32_0 : i32, i32
  }
  func.func @transform_3(%arg0: i32) -> (i32, i32) {
    %c0_i32 = arith.constant 0 : i32
    %c0_i32_0 = arith.constant 0 : i32
    %c0_i32_1 = arith.constant 0 : i32
    return %c0_i32, %c0_i32_0 : i32, i32
  }
  func.func @transform_4(%arg0: i32) -> (i32, i32) {
    %c0_i32 = arith.constant 0 : i32
    %c0_i32_0 = arith.constant 0 : i32
    %c0_i32_1 = arith.constant 0 : i32
    return %c0_i32, %c0_i32_0 : i32, i32
  }
  func.func @transform_5(%arg0: i32) -> (i32, i32) {
    %c0_i32 = arith.constant 0 : i32
    %c0_i32_0 = arith.constant 0 : i32
    %c0_i32_1 = arith.constant 0 : i32
    return %c0_i32, %c0_i32_0 : i32, i32
  }
  func.func @transform_6(%arg0: i32) -> (i32, i32) {
    %c0_i32 = arith.constant 0 : i32
    %c0_i32_0 = arith.constant 0 : i32
    %c0_i32_1 = arith.constant 0 : i32
    return %c0_i32, %c0_i32_0 : i32, i32
  }
  func.func @transform_7(%arg0: i32) -> (i32, i32) {
    %c0_i32 = arith.constant 0 : i32
    %c0_i32_0 = arith.constant 0 : i32
    return %arg0, %c0_i32 : i32, i32
  }
}

</mosaic_0001>

<bundles_post_ra>
// kernel: tpu_custom_call.1
= control target key start
LH: loop header
LB: loop body
LE: loop exit
PB: predicated region body
PF: predicated region fallthrough
CT: control target
= control target key end

     0   :  { %s3454_s0 = inlined_call_operand.hbm [shape: f32[16,128], index: 0, kind: input, shape index: {}]   ;;  %s3455_s1 = inlined_call_operand.hbm [shape: f32[1,128], index: 1, kind: input, shape index: {}]   ;;  %s3456_s2 = inlined_call_operand.vmem [shape: f32[1,128], index: 2, kind: input, shape index: {}]   ;;  %s3457_s3 = inlined_call_operand.hbm [shape: f32[128,256], index: 3, kind: input, shape index: {}]   ;;  %s3458_s4 = inlined_call_operand.vmem [shape: f32[1,256], index: 4, kind: input, shape index: {}]   ;;  %s3459_s5 = inlined_call_operand.hbm [shape: f32[256,128], index: 5, kind: input, shape index: {}]   ;;  %s3460_s6 = inlined_call_operand.vmem [shape: f32[1,128], index: 6, kind: input, shape index: {}]   ;;  %s3461_s7 = inlined_call_operand.hbm [shape: f32[16,128], index: 7, kind: output, shape index: {}]  }
   0x1   :  { %3465 = sst [smem:[#allocation15_spill]] %s3455_s1 }
   0x2   :  { %12 = vsyncpa [#allocation3], 0 }
   0x3   :  { %14 = vsyncpa [#allocation3 + $0x1], 0 }
   0x4   :  { %15 = vsyncpa [#allocation6], 0 }
   0x5   :  { %16 = vsyncpa [#allocation9], 0 }
   0x6   :  { %17 = vsyncpa [#allocation4], 0 }
   0x7   :  { %19 = vsyncpa [#allocation4 + $0x1], 0  ;;  %s2289_s24 = smov 0   ;;  %s2291_s25 = smov 0  }
   0x8   :  { %s2293_s26 = smov 0   ;;  %s2295_s27 = smov 0  }
   0x9 LB: > { %s2310_s28 = sadd.s32 4294967295, %s2239_s27   ;;  %s1938_s29 = sadd.s32 4294967294, %s2239_s27   ;;  %s2239_s27 = sphi %s2295_s27, %s3480_s27   ;;  %s2235_s26 = sphi %s2293_s26, %s3479_s26   ;;  %s2231_s25 = sphi %s2291_s25, %s3478_s25   ;;  %s2227_s24 = sphi %s2289_s24, %s3477_s24  }
   0xa   : > { %p45_p0 = scmp.ne.s32.totalorder %s2231_s25, %s2227_s24  ;;  %p46_p1 = scmp.eq.s32.totalorder %s2310_s28, 0 }
   0xb   : > { %p195_p2 = scmp.eq.s32.totalorder %s2310_s28, 1  ;;  %p201_p3 = scmp.eq.s32.totalorder %s1938_s29, 1 }
   0xc   : > { %p2319_p4 = por %p46_p1, %p45_p0  ;;  %p1939_p5 = scmp.ge.s32.totalorder %s2239_s27, 1 }
   0xd   : > { %p2324_p6 = por %p201_p3, %p45_p0  ;;  %p208_p7 = scmp.lt.s32.totalorder %s2239_s27, 3 }
   0xe   : > { %s3468_s1 = sld [smem:[#allocation15_spill]]  ;;  %s2241_s13 = smov [#allocation5]  }
   0xf   : > { %p2332_p8 = pnand %p1939_p5, %p208_p7  ;;  %s222_s14 = sshll.u32 %s2241_s13, 4  ;;  %s223_s14 = int_to_ptr.vmem [resolvable:$true] %s222_s14 }
  0x10   : > { %s234_s17 = sshll.u32 %s3457_s3, 4  ;;  %s2242_s19 = smov [#allocation7]   ;;  %s235_s17 = int_to_ptr.hbm [resolvable:$true] %s234_s17 }
  0x11   : > { %p1972_p10 = pneg %p2332_p8  ;;  %s236_s20 = sshll.u32 %s2242_s19, 4  ;;  %s237_s20 = int_to_ptr.vmem [resolvable:$true] %s236_s20 }
  0x12   : > { %s2243_s21 = smov 256   ;;  %s2244_s22 = smov 16  }
  0x13   : > { %p2344_p11 = pnand %p1972_p10, %p46_p1  ;;  %s251_s9 = sshll.u32 %s3459_s5, 4  ;;  %s252_s9 = int_to_ptr.hbm [resolvable:$true] %s251_s9 }
  0x14   : > { %s220_s11 = sshll.u32 %s3468_s1, 4  ;;  %s2245_s10 = smov [#allocation8]   ;;  %s221_s11 = int_to_ptr.hbm [resolvable:$true] %s220_s11 }
  0x15   : > { %1975 = dma.hbm_to_vmem [thread:$0]  (!%p2344_p11), %s221_s11, 16, %s223_s14, [#allocation6]  }
  0x16   : > { %1978 = dma.hbm_to_vmem [thread:$0]  (!%p2344_p11), %s235_s17, 4096, %s237_s20, [#allocation6], %s2243_s21, %s2243_s21, %s2244_s22  }
  0x17   : > { %s253_s11 = sshll.u32 %s2245_s10, 4  ;;  %s2246_s13 = smov 128   ;;  %s254_s11 = int_to_ptr.vmem [resolvable:$true] %s253_s11 }
  0x18   : > { %s2247_s14 = smov 8   ;;  %s2358_s15 = sadd.s32 1, %s2239_s27  }
  0x19   : > { %1981 = dma.hbm_to_vmem [thread:$0]  (!%p2344_p11), %s252_s9, 4096, %s254_s11, [#allocation9], %s2246_s13, %s2246_s13, %s2247_s14  }
  0x1a   : > { %s29_s16 = ssub.s32 %s2239_s27, %s2358_s15  ;;  %s32_s17 = sadd.s32 1, %s2235_s26 }
  0x1b   : > { %p30_p12 = scmp.eq.s32.totalorder %s29_s16, 0  ;;  %p39_p13 = scmp.ne.s32.totalorder %s2235_s26, %s2231_s25 }
  0x1c   : > { %p40_p0 = scmp.eq.s32.totalorder %s2239_s27, 0  ;;  %p1993_p5 = scmp.lt.s32.totalorder %s2239_s27, 2 }
  0x1d   : > { %s2367_s19 = scalar_select %p30_p12, %s2235_s26, %s32_s17  }
  0x1e   : > { %p2371_p3 = por %p195_p2, %p39_p13  ;;  %s270_s21 = sand.u32 1, %s2235_s26  }
  0x1f   : > { %s1945_s22 = sshll.u32 %s2239_s27, 3  ;;  %p41_p7 = por %p40_p0, %p39_p13 }
  0x20   : > { %s1944_s18 = sshll.u32 %s270_s21, 3  ;;  %s278_s9 = scalar_lea.hbm %s3454_s0, %s1945_s22 }
  0x21   : > { %s280_s10 = sshll.u32 %s278_s9, 4  ;;  %s274_s11 = scalar_lea.vmem [#allocation2], %s1944_s18  ;;  %s281_s10 = int_to_ptr.hbm [resolvable:$true] %s280_s10 }
  0x22   : > { %s282_s13 = sshll.u32 %s274_s11, 4  ;;  %p2381_p10 = pnand %p1993_p5, %p41_p7  ;;  %s283_s13 = int_to_ptr.vmem [resolvable:$true] %s282_s13 }
  0x23   : > { %s271_s16 = scalar_lea.sflag [#allocation3], %s270_s21  ;;  %s2135_s17 = sshra.s32 %s281_s10, 4  ;;  %s2136_s17 = int_to_ptr.hbm [resolvable:$true] %s2135_s17 }
  0x24   : > { %s2137_s1 = scalar_lea.hbm %s2136_s17, 8  ;;  %p2139_p11 = pneg %p2381_p10 }
  0x25   : > { %p2138_p2 = scmp.ne.s32.totalorder %s2136_s17, %s2137_s1  ;;  %s2142_s18 = scalar_lea.hbm %s3454_s0, 16 }
  0x26   : > { %p2143_p0 = scmp.lt.s32.totalorder %s2136_s17, %s3454_s0  ;;  %p2144_p5 = scmp.lt.s32.totalorder %s2142_s18, %s2137_s1 }
  0x27   : > { %p2140_p12 = pnand %p2139_p11, %p2138_p2 }
  0x28   : > { %p2145_p7 = por %p2144_p5, %p2143_p0 }
  0x29   : > { %p2141_p13 = pneg %p2140_p12 }
  0x2b   : > { %p2146_p9 = pnand %p2145_p7, %p2141_p13 }
  0x2d   : > { %2149 = shalt.err (!%p2146_p9)
}
  0x2e   : > { %1985 = dma.hbm_to_vmem [thread:$0]  (!%p2381_p10), %s281_s10, 128, %s283_s13, %s271_s16  }
  0x2f   : > { %291 = sbr.rel (%p2332_p8) target bundleno = 661 (0x295), region = 48  ;;  %s2398_s21 = sand.u32 (!%p2332_p8), 1, %s2231_s25  }
  0x30   : > { %s1947_s11 = sshll.u32 (!%p2332_p8), %s2398_s21, 3  ;;  %s294_s22 = scalar_lea.sflag (!%p2332_p8), [#allocation3], %s2398_s21 }
  0x31   : > { %s297_s1 = scalar_lea.vmem (!%p2332_p8), [#allocation2], %s1947_s11 }
  0x34   : > { %2210 = dma.done.wait (%p2319_p4), %s294_s22, 128  }
  0x35   : > { %2212 = vsyncadd (%p2319_p4), %s294_s22, 4294967168 }
  0x36   : > { %2214 = dma.done.wait (%p46_p1), [#allocation6], 4112  }
  0x37   : > { %2216 = vsyncadd (%p46_p1), [#allocation6], 4294963184 }
  0x38   : > { %2218 = dma.done.wait (%p46_p1), [#allocation9], 4096  }
  0x39   : > { %2220 = vsyncadd (%p46_p1), [#allocation9], 4294963200  ;;  %v2416_v0 = vld [vmem:[%s297_s1] sm:$0xff]  ;;  %v2248_v1 = vmov 128.0   ;;  %v410_v3 = vld [vmem:[#allocation7 + $0xe0] sm:$0xff]  ;;  %s1953_s17 = sshll.u32 %s2310_s28, 3 }
  0x3a   : > { %347 = vadd.xlane.f32.xlu0 %v2416_v0  ;;  %2041 = vrcp.f32 %v2248_v1  ;;  %v412_v2 = vld [vmem:[#allocation7 + $0xf0] sm:$0xff]  ;;  %v2421_v6 = vand.u32 4294901760, %v410_v3  ;;  %v406_v8 = vld [vmem:[#allocation7 + $0xc0] sm:$0xff]  ;;  %s1834_s29 = scalar_lea.hbm %s3461_s7, %s1953_s17  ;;  %s343_s9 = scalar_lea.vmem [#allocation10], %s1947_s11 }
  0x3b   : > { %v408_v4 = vld [vmem:[#allocation7 + $0xd0] sm:$0xff]  ;;  %v2419_v5 = vand.u32 4294901760, %v412_v2  ;;  %v402_v10 = vld [vmem:[#allocation7 + $0xa0] sm:$0xff]  ;;  %v2425_v11 = vand.u32 4294901760, %v406_v8  ;;  %s1836_s22 = sshll.u32 %s343_s9, 4  ;;  %s1838_s1 = sshll.u32 %s1834_s29, 4  ;;  %s1837_s22 = int_to_ptr.vmem [resolvable:$true] %s1836_s22  ;;  %s1839_s1 = int_to_ptr.hbm [resolvable:$true] %s1838_s1 }
  0x3c   : > { %v2423_v7 = vand.u32 4294901760, %v408_v4  ;;  %v404_v9 = vld [vmem:[#allocation7 + $0xb0] sm:$0xff]  ;;  %v2429_v13 = vand.u32 4294901760, %v402_v10  ;;  %v398_v15 = vld [vmem:[#allocation7 + $0x80] sm:$0xff]  ;;  %v2437_v18 = vsub.f32 %v410_v3, %v2421_v6  ;;  %s1824_s28 = scalar_lea.sflag [#allocation4], %s2398_s21  ;;  %s2179_s30 = sshra.s32 %s1839_s1, 4  ;;  %s2180_s30 = int_to_ptr.hbm [resolvable:$true] %s2179_s30 }
  0x3d   : > { %v2427_v12 = vand.u32 4294901760, %v404_v9  ;;  %v400_v14 = vld [vmem:[#allocation7 + $0x90] sm:$0xff]  ;;  %v2434_v17 = vsub.f32 %v412_v2, %v2419_v5  ;;  %617 = vmatpush.msra.mxu3 %v2419_v5  ;;  %421 = vmatpush.msra.mxu0 %v2419_v5  ;;  %v2447_v21 = vsub.f32 %v406_v8, %v2425_v11  ;;  %v2455_v24 = vand.u32 4294901760, %v398_v15  ;;  %v394_v38 = vld [vmem:[#allocation7 + $0x60] sm:$0xff]  ;;  %s2181_s12 = scalar_lea.hbm %s2180_s30, 8  ;;  %s2185_s11 = scalar_lea.hbm %s3461_s7, 16 }
  0x3e   : > { %v2440_v19 = vsub.f32 %v408_v4, %v2423_v7  ;;  %v2444_v20 = vand.u32 4294901760, %v400_v14  ;;  %v2453_v23 = vsub.f32 %v402_v10, %v2429_v13  ;;  %v469_v26 = vand.u32 4294901760, %v2437_v18  ;;  %v396_v37 = vld [vmem:[#allocation7 + $0x70] sm:$0xff]  ;;  %v390_v46 = vld [vmem:[#allocation7 + $0x40] sm:$0xff]  ;;  %p2182_p1 = scmp.ne.s32.totalorder %s2180_s30, %s2181_s12  ;;  %p2186_p9 = scmp.lt.s32.totalorder %s2180_s30, %s3461_s7 }
  0x3f   : > { %v2450_v22 = vsub.f32 %v404_v9, %v2427_v12  ;;  %v463_v25 = vand.u32 4294901760, %v2434_v17  ;;  %564 = vmatpush.msra.mxu2 %v2434_v17  ;;  %619 = vmatpush.msra.mxu3 %v2421_v6  ;;  %v481_v29 = vand.u32 4294901760, %v2447_v21  ;;  %v2483_v36 = vsub.f32 %v398_v15, %v2455_v24  ;;  %v392_v39 = vld [vmem:[#allocation7 + $0x50] sm:$0xff]  ;;  %v386_v60 = vld [vmem:[#allocation7 + $0x20] sm:$0xff]  ;;  %p2187_p10 = scmp.lt.s32.totalorder %s2185_s11, %s2181_s12 }
  0x40   : > { %v2431_v16 = vpop.eup %2041  ;;  %v475_v27 = vand.u32 4294901760, %v2440_v19  ;;  %423 = vmatpush.msra.mxu0 %v2421_v6  ;;  %v2467_v31 = vsub.f32 %v400_v14, %v2444_v20  ;;  %v470_v33 = vsub.f32 %v2437_v18, %v469_v26  ;;  %v493_v35 = vand.u32 4294901760, %v2453_v23  ;;  %v388_v53 = vld [vmem:[#allocation7 + $0x30] sm:$0xff]  ;;  %p2183_p4 = pnand %p2182_p1, %p2371_p3 }
  0x41   : > { %v350_v28 = vmul.f32 128.0, %v2431_v16  ;;  %v487_v30 = vand.u32 4294901760, %v2450_v22  ;;  %v464_v32 = vsub.f32 %v2434_v17, %v463_v25  ;;  %567 = vmatpush.msra.mxu2 %v2437_v18  ;;  %621 = vmatpush.msra.mxu3 %v2423_v7  ;;  %v482_v42 = vsub.f32 %v2447_v21, %v481_v29  ;;  %v384_v3 = vld [vmem:[#allocation7 + $0x10] sm:$0xff]  ;;  %p2188_p2 = por %p2187_p10, %p2186_p9 }
  0x42   : > { %v476_v34 = vsub.f32 %v2440_v19, %v475_v27  ;;  %425 = vmatpush.msra.mxu0 %v2423_v7  ;;  %v471_v41 = vand.u32 4294901760, %v470_v33  ;;  %v499_v45 = vand.u32 4294901760, %v2467_v31  ;;  %v2496_v48 = vand.u32 4294901760, %v396_v37  ;;  %p2184_p8 = pneg %p2183_p4 }
  0x43   : > { %v465_v40 = vand.u32 4294901760, %v464_v32  ;;  %570 = vmatpush.msra.mxu2 %v2440_v19  ;;  %623 = vmatpush.msra.mxu3 %v2425_v11  ;;  %v351_v43 = vsub.f32 1.0, %v350_v28  ;;  %v488_v44 = vsub.f32 %v2450_v22, %v487_v30  ;;  %v2498_v49 = vand.u32 4294901760, %v394_v38  ;;  %v382_v28 = vld [vmem:[#allocation7] sm:$0xff] }
  0x44   : > { %427 = vmatpush.msra.mxu0 %v2425_v11  ;;  %v477_v47 = vand.u32 4294901760, %v476_v34  ;;  %v2500_v50 = vand.u32 4294901760, %v392_v39  ;;  %v494_v51 = vsub.f32 %v2453_v23, %v493_v35  ;;  %v505_v52 = vand.u32 4294901760, %v2483_v36  ;;  %p2189_p11 = pnand %p2188_p2, %p2184_p8 }
  0x45   : > { %466 = vmatpush.msra.mxu1 %v465_v40  ;;  %573 = vmatpush.msra.mxu2 %v2447_v21  ;;  %v483_v54 = vand.u32 4294901760, %v482_v42  ;;  %v2510_v55 = vsub.f32 %v396_v37, %v2496_v48  ;;  %v2513_v56 = vsub.f32 %v394_v38, %v2498_v49  ;;  %v2515_v57 = vand.u32 4294901760, %v390_v46 }
  0x46   : > { %625 = vmatpush.msra.mxu3 %v2427_v12  ;;  %429 = vmatpush.msra.mxu0 %v2427_v12  ;;  %v352_v58 = vmul.f32 %v2431_v16, %v351_v43  ;;  %v500_v59 = vsub.f32 %v2467_v31, %v499_v45  ;;  %v489_v61 = vand.u32 4294901760, %v488_v44  ;;  %v2526_v63 = vsub.f32 %v392_v39, %v2500_v50 }
  0x47   : > { %472 = vmatpush.msra.mxu1 %v471_v41  ;;  %576 = vmatpush.msra.mxu2 %v2450_v22  ;;  %v511_v62 = vand.u32 4294901760, %v2510_v55  ;;  %v2528_v1 = vand.u32 4294901760, %v388_v53  ;;  %v506_v2 = vsub.f32 %v2483_v36, %v505_v52  ;;  %v495_v4 = vand.u32 4294901760, %v494_v51 }
  0x48   : > { %627 = vmatpush.msra.mxu3 %v2429_v13  ;;  %431 = vmatpush.msra.mxu0 %v2429_v13  ;;  %v517_v8 = vand.u32 4294901760, %v2513_v56  ;;  %v2538_v9 = vsub.f32 %v390_v46, %v2515_v57  ;;  %v2540_v10 = vand.u32 4294901760, %v386_v60  ;;  %v353_v14 = vadd.f32 %v2431_v16, %v352_v58 }
  0x49   : > { %478 = vmatpush.msra.mxu1 %v477_v47  ;;  %579 = vmatpush.msra.mxu2 %v2453_v23  ;;  %vm354_vm0 = vweird.f32 %v2431_v16  ;;  %v501_v15 = vand.u32 4294901760, %v500_v59  ;;  %v512_v32 = vsub.f32 %v2510_v55, %v511_v62  ;;  %v523_v33 = vand.u32 4294901760, %v2526_v63 }
  0x4a   : > { %629 = vmatpush.msra.mxu3 %v2444_v20  ;;  %433 = vmatpush.msra.mxu0 %v2444_v20  ;;  %v2552_v34 = vsub.f32 %v388_v53, %v2528_v1  ;;  %v2554_v37 = vand.u32 4294901760, %v384_v3  ;;  %v507_v38 = vand.u32 4294901760, %v506_v2  ;;  %v518_v39 = vsub.f32 %v2513_v56, %v517_v8 }
  0x4b   : > { %484 = vmatpush.msra.mxu1 %v483_v54  ;;  %582 = vmatpush.msra.mxu2 %v2467_v31  ;;  %v529_v40 = vand.u32 4294901760, %v2538_v9  ;;  %v2564_v41 = vsub.f32 %v386_v60, %v2540_v10  ;;  %v2566_v42 = vand.u32 4294901760, %v382_v28  ;;  %v2571_v43 = vsel %vm354_vm0, %v2431_v16, %v353_v14 }
  0x4c   : > { %631 = vmatpush.msra.mxu3 %v2455_v24  ;;  %435 = vmatpush.msra.mxu0 %v2455_v24  ;;  %v513_v44 = vand.u32 4294901760, %v512_v32  ;;  %v524_v46 = vsub.f32 %v2526_v63, %v523_v33  ;;  %v535_v47 = vand.u32 4294901760, %v2552_v34  ;;  %v2581_v51 = vsub.f32 %v384_v3, %v2554_v37 }
  0x4d   : > { %490 = vmatpush.msra.mxu1 %v489_v61  ;;  %585 = vmatpush.msra.mxu2 %v2483_v36  ;;  %v519_v53 = vand.u32 4294901760, %v518_v39  ;;  %v530_v54 = vsub.f32 %v2538_v9, %v529_v40  ;;  %v541_v58 = vand.u32 4294901760, %v2564_v41  ;;  %v2591_v59 = vsub.f32 %v382_v28, %v2566_v42 }
  0x4e   : > { %633 = vmatpush.msra.mxu3 %v2496_v48  ;;  %437 = vmatpush.msra.mxu0 %v2496_v48  ;;  %v525_v61 = vand.u32 4294901760, %v524_v46  ;;  %v536_v2 = vsub.f32 %v2552_v34, %v535_v47  ;;  %v547_v3 = vand.u32 4294901760, %v2581_v51 }
  0x4f   : > { %496 = vmatpush.msra.mxu1 %v495_v4  ;;  %588 = vmatpush.msra.mxu2 %v2510_v55  ;;  %v531_v14 = vand.u32 4294901760, %v530_v54  ;;  %v553_v28 = vand.u32 4294901760, %v2591_v59 }
  0x50   : > { %635 = vmatpush.msra.mxu3 %v2498_v49  ;;  %439 = vmatpush.msra.mxu0 %v2498_v49 }
  0x51   : > { %502 = vmatpush.msra.mxu1 %v501_v15  ;;  %591 = vmatpush.msra.mxu2 %v2513_v56  ;;  %v542_v15 = vsub.f32 %v2564_v41, %v541_v58 }
  0x52   : > { %637 = vmatpush.msra.mxu3 %v2500_v50  ;;  %441 = vmatpush.msra.mxu0 %v2500_v50 }
  0x53   : > { %508 = vmatpush.msra.mxu1 %v507_v38  ;;  %594 = vmatpush.msra.mxu2 %v2526_v63  ;;  %v548_v38 = vsub.f32 %v2581_v51, %v547_v3  ;;  %v543_v39 = vand.u32 4294901760, %v542_v15 }
  0x54   : > { %639 = vmatpush.msra.mxu3 %v2515_v57  ;;  %443 = vmatpush.msra.mxu0 %v2515_v57 }
  0x55   : > { %514 = vmatpush.msra.mxu1 %v513_v44  ;;  %597 = vmatpush.msra.mxu2 %v2538_v9  ;;  %v554_v44 = vsub.f32 %v2591_v59, %v553_v28  ;;  %v549_v46 = vand.u32 4294901760, %v548_v38 }
  0x56   : > { %641 = vmatpush.msra.mxu3 %v2528_v1  ;;  %445 = vmatpush.msra.mxu0 %v2528_v1 }
  0x57   : > { %520 = vmatpush.msra.mxu1 %v519_v53  ;;  %600 = vmatpush.msra.mxu2 %v2552_v34  ;;  %v395_v53 = vld [vmem:[#allocation7 + $0x68] sm:$0xff] }
  0x58   : > { %643 = vmatpush.msra.mxu3 %v2540_v10  ;;  %447 = vmatpush.msra.mxu0 %v2540_v10 }
  0x59   : > { %526 = vmatpush.msra.mxu1 %v525_v61  ;;  %603 = vmatpush.msra.mxu2 %v2564_v41 }
  0x5a   : > { %645 = vmatpush.msra.mxu3 %v2554_v37  ;;  %449 = vmatpush.msra.mxu0 %v2554_v37 }
  0x5b   : > { %532 = vmatpush.msra.mxu1 %v531_v14  ;;  %606 = vmatpush.msra.mxu2 %v2581_v51 }
  0x5c   : > { %647 = vmatpush.msra.mxu3 %v2566_v42  ;;  %451 = vmatpush.msra.mxu0 %v2566_v42 }
  0x5d   : > { %609 = vmatpush.msra.mxu2 %v2591_v59  ;;  %v2747_v59 = vand.u32 4294901760, %v395_v53 }
  0x5e   : > { %658 = vmatpush.msrb.mxu0 %v463_v25  ;;  %v405_v25 = vld [vmem:[#allocation7 + $0xb8] sm:$0xff] }
  0x60   : > { %662 = vmatpush.msrb.mxu0 %v469_v26 }
  0x62   : > { %666 = vmatpush.msrb.mxu0 %v475_v27 }
  0x64   : > { %670 = vmatpush.msrb.mxu0 %v481_v29 }
  0x66   : > { %674 = vmatpush.msrb.mxu0 %v487_v30  ;;  %v2698_v30 = vand.u32 4294901760, %v405_v25 }
  0x68   : > { %678 = vmatpush.msrb.mxu0 %v493_v35  ;;  %v403_v35 = vld [vmem:[#allocation7 + $0xa8] sm:$0xff] }
  0x6a   : > { %682 = vmatpush.msrb.mxu0 %v499_v45 }
  0x6c   : > { %686 = vmatpush.msrb.mxu0 %v505_v52  ;;  %v401_v52 = vld [vmem:[#allocation7 + $0x98] sm:$0xff] }
  0x6e   : > { %690 = vmatpush.msrb.mxu0 %v511_v62 }
  0x70   : > { %694 = vmatpush.msrb.mxu0 %v517_v8 }
  0x72   : > { %698 = vmatpush.msrb.mxu0 %v523_v33 }
  0x74   : > { %702 = vmatpush.msrb.mxu0 %v529_v40 }
  0x76   : > { %706 = vmatpush.msrb.mxu0 %v535_v47 }
  0x78   : > { %710 = vmatpush.msrb.mxu0 %v541_v58 }
  0x7a   : > { %714 = vmatpush.msrb.mxu0 %v547_v3 }
  0x7c   : > { %718 = vmatpush.msrb.mxu0 %v553_v28  ;;  %v2758_v28 = vsub.f32 %v395_v53, %v2747_v59  ;;  %v383_v53 = vld [vmem:[#allocation7 + $0x8] sm:$0xff] }
  0xad   : > { %v348_v16 = vpop.xlane.xlu0 %347 }
  0xae   : > { %v356_v60 = vmul.f32 %v2571_v43, %v348_v16  ;;  %v555_v16 = vand.u32 4294901760, %v554_v44 }
  0xb0   : > { %v2602_v4 = vsub.f32 %v2416_v0, %v356_v60  ;;  %v537_v0 = vand.u32 4294901760, %v536_v2  ;;  %v393_v2 = vld [vmem:[#allocation7 + $0x58] sm:$0xff] }
  0xb1   : > { %v2755_v15 = vand.u32 4294901760, %v393_v2 }
  0xb2   : > { %v358_v32 = vmul.f32 %v2602_v4, %v2602_v4  ;;  %538 = vmatpush.msra.mxu1 %v537_v0  ;;  %v391_v0 = vld [vmem:[#allocation7 + $0x48] sm:$0xff] }
  0xb3   : > { %v2768_v44 = vand.u32 4294901760, %v391_v0 }
  0xb4   : > { %359 = vadd.xlane.f32.xlu0 %v358_v32  ;;  %544 = vmatpush.msra.mxu1 %v543_v39  ;;  %v858_v39 = vand.u32 4294901760, %v2758_v28 }
  0xb6   : > { %550 = vmatpush.msra.mxu1 %v549_v46  ;;  %v2771_v46 = vsub.f32 %v393_v2, %v2755_v15 }
  0xb8   : > { %556 = vmatpush.msra.mxu1 %v555_v16 }
  0xba   : > { %725 = vmatpush.msrb.mxu1 %v2419_v5  ;;  %v413_v5 = vld [vmem:[#allocation7 + $0xf8] sm:$0xff] }
  0xbc   : > { %727 = vmatpush.msrb.mxu1 %v2421_v6  ;;  %v2668_v6 = vand.u32 4294901760, %v413_v5 }
  0xbe   : > { %729 = vmatpush.msrb.mxu1 %v2423_v7  ;;  %v411_v7 = vld [vmem:[#allocation7 + $0xe8] sm:$0xff]  ;;  %762 = vmatpush.msrb.mxu2 %v2668_v6 }
  0xc0   : > { %731 = vmatpush.msrb.mxu1 %v2425_v11  ;;  %v2671_v11 = vand.u32 4294901760, %v411_v7 }
  0xc2   : > { %733 = vmatpush.msrb.mxu1 %v2427_v12  ;;  %v2674_v12 = vsub.f32 %v413_v5, %v2668_v6  ;;  %764 = vmatpush.msrb.mxu2 %v2671_v11  ;;  %v2681_v19 = vsub.f32 %v411_v7, %v2671_v11  ;;  %v389_v5 = vld [vmem:[#allocation7 + $0x38] sm:$0xff] }
  0xc4   : > { %735 = vmatpush.msrb.mxu1 %v2429_v13  ;;  %v409_v13 = vld [vmem:[#allocation7 + $0xd8] sm:$0xff]  ;;  %v804_v17 = vand.u32 4294901760, %v2674_v12  ;;  %v810_v22 = vand.u32 4294901760, %v2681_v19 }
  0xc5   : > { %v2678_v18 = vand.u32 4294901760, %v409_v13 }
  0xc6   : > { %737 = vmatpush.msrb.mxu1 %v2444_v20  ;;  %v407_v20 = vld [vmem:[#allocation7 + $0xc8] sm:$0xff]  ;;  %v805_v21 = vsub.f32 %v2674_v12, %v804_v17  ;;  %v811_v27 = vsub.f32 %v2681_v19, %v810_v22 }
  0xc7   : > { %766 = vmatpush.msrb.mxu2 %v2678_v18  ;;  %v2688_v23 = vand.u32 4294901760, %v407_v20 }
  0xc8   : > { %739 = vmatpush.msrb.mxu1 %v2455_v24  ;;  %v2691_v24 = vsub.f32 %v409_v13, %v2678_v18  ;;  %v806_v26 = vand.u32 4294901760, %v805_v21  ;;  %v812_v36 = vand.u32 4294901760, %v811_v27  ;;  %v859_v13 = vsub.f32 %v2758_v28, %v858_v39 }
  0xc9   : > { %768 = vmatpush.msrb.mxu2 %v2688_v23  ;;  %v2701_v31 = vsub.f32 %v407_v20, %v2688_v23  ;;  %v864_v20 = vand.u32 4294901760, %v2771_v46  ;;  %v2778_v21 = vand.u32 4294901760, %v389_v5 }
  0xca   : > { %741 = vmatpush.msrb.mxu1 %v2496_v48  ;;  %v816_v29 = vand.u32 4294901760, %v2691_v24  ;;  %807 = vmatpush.msrb.mxu3 %v806_v26  ;;  %v2707_v48 = vand.u32 4294901760, %v403_v35  ;;  %v387_v26 = vld [vmem:[#allocation7 + $0x28] sm:$0xff]  ;;  %v860_v27 = vand.u32 4294901760, %v859_v13 }
  0xcb   : > { %770 = vmatpush.msrb.mxu2 %v2698_v30 }
  0xcc   : > { %743 = vmatpush.msrb.mxu1 %v2498_v49  ;;  %v817_v45 = vsub.f32 %v2691_v24, %v816_v29  ;;  %v2710_v49 = vsub.f32 %v405_v25, %v2698_v30  ;;  %813 = vmatpush.msrb.mxu3 %v812_v36  ;;  %v2718_v62 = vsub.f32 %v403_v35, %v2707_v48  ;;  %v2787_v36 = vand.u32 4294901760, %v387_v26 }
  0xcd   : > { %772 = vmatpush.msrb.mxu2 %v2707_v48  ;;  %v2781_v25 = vsub.f32 %v391_v0, %v2768_v44  ;;  %v865_v35 = vsub.f32 %v2771_v46, %v864_v20 }
  0xce   : > { %745 = vmatpush.msrb.mxu1 %v2500_v50  ;;  %v822_v50 = vand.u32 4294901760, %v2701_v31  ;;  %v818_v55 = vand.u32 4294901760, %v817_v45  ;;  %v828_v56 = vand.u32 4294901760, %v2710_v49  ;;  %v834_v9 = vand.u32 4294901760, %v2718_v62 }
  0xcf   : > { %v2790_v45 = vsub.f32 %v389_v5, %v2778_v21 }
  0xd0   : > { %747 = vmatpush.msrb.mxu1 %v2515_v57  ;;  %v2715_v57 = vand.u32 4294901760, %v401_v52  ;;  %v823_v63 = vsub.f32 %v2701_v31, %v822_v50  ;;  %819 = vmatpush.msrb.mxu3 %v818_v55  ;;  %v829_v8 = vsub.f32 %v2710_v49, %v828_v56  ;;  %v835_v41 = vsub.f32 %v2718_v62, %v834_v9  ;;  %v385_v55 = vld [vmem:[#allocation7 + $0x18] sm:$0xff] }
  0xd2   : > { %749 = vmatpush.msrb.mxu1 %v2528_v1  ;;  %v399_v1 = vld [vmem:[#allocation7 + $0x88] sm:$0xff]  ;;  %774 = vmatpush.msrb.mxu2 %v2715_v57  ;;  %v2731_v33 = vsub.f32 %v401_v52, %v2715_v57  ;;  %v824_v34 = vand.u32 4294901760, %v823_v63  ;;  %v830_v40 = vand.u32 4294901760, %v829_v8  ;;  %v836_v54 = vand.u32 4294901760, %v835_v41 }
  0xd3   : > { %v870_v52 = vand.u32 4294901760, %v2781_v25  ;;  %v866_v63 = vand.u32 4294901760, %v865_v35  ;;  %v2795_v8 = vand.u32 4294901760, %v385_v55 }
  0xd4   : > { %751 = vmatpush.msrb.mxu1 %v2540_v10  ;;  %v2728_v10 = vand.u32 4294901760, %v399_v1  ;;  %825 = vmatpush.msrb.mxu3 %v824_v34  ;;  %v2798_v34 = vsub.f32 %v387_v26, %v2787_v36 }
  0xd5   : > { %v2811_v2 = vsub.f32 %v385_v55, %v2795_v8 }
  0xd6   : > { %753 = vmatpush.msrb.mxu1 %v2554_v37  ;;  %v397_v37 = vld [vmem:[#allocation7 + $0x78] sm:$0xff]  ;;  %776 = vmatpush.msrb.mxu2 %v2728_v10  ;;  %v2741_v51 = vsub.f32 %v399_v1, %v2728_v10  ;;  %v876_v1 = vand.u32 4294901760, %v2790_v45  ;;  %v882_v41 = vand.u32 4294901760, %v2798_v34 }
  0xd7   : > { %v2738_v47 = vand.u32 4294901760, %v397_v37  ;;  %831 = vmatpush.msrb.mxu3 %v830_v40  ;;  %v888_v0 = vand.u32 4294901760, %v2811_v2 }
  0xd8   : > { %755 = vmatpush.msrb.mxu1 %v2566_v42  ;;  %v840_v42 = vand.u32 4294901760, %v2731_v33  ;;  %v846_v61 = vand.u32 4294901760, %v2741_v51  ;;  %v877_v40 = vsub.f32 %v2790_v45, %v876_v1 }
  0xd9   : > { %778 = vmatpush.msrb.mxu2 %v2738_v47  ;;  %v2750_v60 = vsub.f32 %v397_v37, %v2738_v47  ;;  %837 = vmatpush.msrb.mxu3 %v836_v54  ;;  %v871_v37 = vsub.f32 %v2781_v25, %v870_v52  ;;  %v889_v5 = vsub.f32 %v2811_v2, %v888_v0 }
  0xda   : > { %v841_v58 = vsub.f32 %v2731_v33, %v840_v42  ;;  %v847_v32 = vsub.f32 %v2741_v51, %v846_v61 }
  0xdb   : > { %780 = vmatpush.msrb.mxu2 %v2747_v59  ;;  %v852_v14 = vand.u32 4294901760, %v2750_v60  ;;  %v872_v54 = vand.u32 4294901760, %v871_v37  ;;  %v890_v13 = vand.u32 4294901760, %v889_v5 }
  0xdc   : > { %v842_v3 = vand.u32 4294901760, %v841_v58  ;;  %v848_v16 = vand.u32 4294901760, %v847_v32  ;;  %v2808_v58 = vand.u32 4294901760, %v383_v53  ;;  %v883_v32 = vsub.f32 %v2798_v34, %v882_v41 }
  0xdd   : > { %v853_v38 = vsub.f32 %v2750_v60, %v852_v14  ;;  %782 = vmatpush.msrb.mxu2 %v2755_v15 }
  0xde   : > { %843 = vmatpush.msrb.mxu3 %v842_v3  ;;  %v878_v3 = vand.u32 4294901760, %v877_v40 }
  0xdf   : > { %v854_v7 = vand.u32 4294901760, %v853_v38  ;;  %784 = vmatpush.msrb.mxu2 %v2768_v44  ;;  %v2819_v38 = vsub.f32 %v383_v53, %v2808_v58 }
  0xe0   : > { %849 = vmatpush.msrb.mxu3 %v848_v16  ;;  %v884_v16 = vand.u32 4294901760, %v883_v32 }
  0xe1   : > { %786 = vmatpush.msrb.mxu2 %v2778_v21 }
  0xe2   : > { %855 = vmatpush.msrb.mxu3 %v854_v7  ;;  %v3462_v7 = vand.u32 4294901760, %v2819_v38 }
  0xe3   : > { %788 = vmatpush.msrb.mxu2 %v2787_v36 }
  0xe4   : > { %861 = vmatpush.msrb.mxu3 %v860_v27  ;;  %v895_v26 = vsub.f32 %v2819_v38, %v3462_v7 }
  0xe5   : > { %790 = vmatpush.msrb.mxu2 %v2795_v8 }
  0xe6   : > { %867 = vmatpush.msrb.mxu3 %v866_v63  ;;  %v896_v55 = vand.u32 4294901760, %v895_v26 }
  0xe7   : > { %792 = vmatpush.msrb.mxu2 %v2808_v58 }
  0xe8   : > { %873 = vmatpush.msrb.mxu3 %v872_v54 }
  0xea   : > { %879 = vmatpush.msrb.mxu3 %v878_v3 }
  0xec   : > { %885 = vmatpush.msrb.mxu3 %v884_v16  ;;  %v2038_v16 = vld [vmem:[#allocation5] ss:$0 sm:$0xff] }
  0xee   : > { %891 = vmatpush.msrb.mxu3 %v890_v13 }
  0xf0   : > { %897 = vmatpush.msrb.mxu3 %v896_v55 }
 0x127   : > { %v360_v27 = vpop.xlane.xlu0 %359 }
 0x128   : > { %v361_v35 = vmul.f32 %v360_v27, %v2571_v43  ;;  %v2039_v43 = vld [vmem:[%s3456_s2] ss:$0 sm:$0xff] }
 0x12a   : > { %v362_v63 = vadd.f32 1e-05, %v361_v35 }
 0x12c   : > { %2043 = vrsqrt.f32 %v362_v63  ;;  %vm369_vm2 = vweird.f32 %v362_v63 }
 0x132   : > { %v2044_v37 = vpop.eup %2043 }
 0x133   : > { %v364_v40 = vmul.f32 %v2044_v37, %v362_v63  ;;  %vm370_vm1 = vweird.f32 %v2044_v37 }
 0x134   : > { %vm371_vm3 = vmor %vm369_vm2, %vm370_vm1 }
 0x135   : > { %v365_v53 = vmul.f32 %v2044_v37, %v364_v40 }
 0x137   : > { %v366_v54 = vmul.f32 0.5, %v365_v53 }
 0x139   : > { %v367_v3 = vsub.f32 1.5, %v366_v54 }
 0x13b   : > { %v368_v32 = vmul.f32 %v2044_v37, %v367_v3  ;;  %v1107_v3 = vld [vmem:[#allocation8 + $0x18] sm:$0xff] }
 0x13d   : > { %v372_v5 = vsel %vm371_vm3, %v2044_v37, %v368_v32  ;;  %v1108_v37 = vld [vmem:[#allocation8 + $0x20] sm:$0xff] }
 0x13e   : > { %v373_v7 = vmul.f32 %v372_v5, %v2602_v4  ;;  %v3010_v5 = vand.u32 4294901760, %v1108_v37 }
 0x140   : > { %v377_v13 = vmul.f32 %v2038_v16, %v373_v7 }
 0x142   : > { %v381_v26 = vadd.f32 %v2039_v43, %v377_v13  ;;  %v1106_v43 = vld [vmem:[#allocation8 + $0x10] sm:$0xff] }
 0x144   : > { %v2833_v27 = vand.u32 4294901760, %v381_v26 }
 0x146   : > { %558 = vmatmul.f32.vlgmr.msra.gmra.mxu1 %v2833_v27  ;;  %v2837_v35 = vsub.f32 %v381_v26, %v2833_v27 }
 0x147   : > { %958 = vmatpush.msra.mxu1 %v2668_v6 }
 0x148   : > { %612 = vmatmul.f32.vlgmr.msra.gmra.mxu2 %v2837_v35  ;;  %v2842_v55 = vand.u32 4294901760, %v2837_v35 }
 0x149   : > { %960 = vmatpush.msra.mxu1 %v2671_v11  ;;  %999 = vmatpush.msra.mxu2 %v804_v17  ;;  %v1117_v17 = vld [vmem:[#allocation8 + $0x68] sm:$0xff] }
 0x14a   : > { %651 = vmatmul.f32.vlgmr.msra.gmra.mxu3 %v2842_v55  ;;  %v455_v4 = vsub.f32 %v2837_v35, %v2842_v55 }
 0x14b   : > { %962 = vmatpush.msra.mxu1 %v2678_v18  ;;  %1003 = vmatpush.msra.mxu2 %v810_v22 }
 0x14c   : > { %1066 = vmatpush.msra.mxu3 %v2668_v6  ;;  %v456_v7 = vand.u32 4294901760, %v455_v4  ;;  %v1119_v6 = vld [vmem:[#allocation8 + $0x78] sm:$0xff]  ;;  %v1105_v4 = vld [vmem:[#allocation8 + $0x8] sm:$0xff] }
 0x14d   : > { %964 = vmatpush.msra.mxu1 %v2688_v23  ;;  %1007 = vmatpush.msra.mxu2 %v816_v29 }
 0x14e   : > { %1068 = vmatpush.msra.mxu3 %v2671_v11  ;;  %457 = vmatmul.f32.vlgmr.msra.gmra.mxu0 %v456_v7  ;;  %v1118_v11 = vld [vmem:[#allocation8 + $0x70] sm:$0xff] }
 0x14f   : > { %757 = vmatmul.f32.vlgmr.msrb.gmra.mxu1 %v2833_v27  ;;  %905 = vmatpush.msra.mxu0 %v2674_v12  ;;  %v2881_v12 = vand.u32 4294901760, %v1119_v6 }
 0x150   : > { %966 = vmatpush.msra.mxu1 %v2698_v30  ;;  %1011 = vmatpush.msra.mxu2 %v822_v50 }
 0x151   : > { %1070 = vmatpush.msra.mxu3 %v2678_v18  ;;  %798 = vmatmul.f32.vlgmr.msrb.gmra.mxu2 %v456_v7  ;;  %v2888_v18 = vand.u32 4294901760, %v1118_v11  ;;  %v2896_v22 = vsub.f32 %v1119_v6, %v2881_v12  ;;  %v3032_v6 = vsub.f32 %v1108_v37, %v3010_v5 }
 0x152   : > { %908 = vmatpush.msra.mxu0 %v2681_v19  ;;  %968 = vmatpush.msra.mxu1 %v2707_v48  ;;  %v1116_v19 = vld [vmem:[#allocation8 + $0x60] sm:$0xff] }
 0x153   : > { %1015 = vmatpush.msra.mxu2 %v828_v56  ;;  %1072 = vmatpush.msra.mxu3 %v2688_v23  ;;  %v2898_v23 = vand.u32 4294901760, %v1117_v17  ;;  %v2906_v29 = vsub.f32 %v1118_v11, %v2888_v18  ;;  %v1113_v56 = vld [vmem:[#allocation8 + $0x48] sm:$0xff]  ;;  %v3034_v11 = vand.u32 4294901760, %v1106_v43 }
 0x154   : > { %899 = vmatmul.f32.vlgmr.msrb.gmra.mxu3 %v2833_v27  ;;  %911 = vmatpush.msra.mxu0 %v2691_v24  ;;  %v1115_v24 = vld [vmem:[#allocation8 + $0x58] sm:$0xff] }
 0x155   : > { %970 = vmatpush.msra.mxu1 %v2715_v57  ;;  %1019 = vmatpush.msra.mxu2 %v834_v9  ;;  %v2919_v50 = vand.u32 4294901760, %v1115_v24 }
 0x156   : > { %1074 = vmatpush.msra.mxu3 %v2698_v30  ;;  %914 = vmatpush.msra.mxu0 %v2701_v31  ;;  %v2908_v30 = vand.u32 4294901760, %v1116_v19  ;;  %v1114_v31 = vld [vmem:[#allocation8 + $0x50] sm:$0xff] }
 0x157   : > { %972 = vmatpush.msra.mxu1 %v2728_v10  ;;  %1023 = vmatpush.msra.mxu2 %v840_v42  ;;  %v2930_v9 = vand.u32 4294901760, %v1114_v31 }
 0x158   : > { %1076 = vmatpush.msra.mxu3 %v2707_v48  ;;  %720 = vmatmul.f32.vlgmr.msrb.gmra.mxu0 %v2833_v27  ;;  %v1183_v48 = vand.u32 4294901760, %v2896_v22 }
 0x159   : > { %917 = vmatpush.msra.mxu0 %v2710_v49  ;;  %974 = vmatpush.msra.mxu1 %v2738_v47  ;;  %v2917_v49 = vsub.f32 %v1117_v17, %v2898_v23 }
 0x15a   : > { %1027 = vmatpush.msra.mxu2 %v846_v61  ;;  %1078 = vmatpush.msra.mxu3 %v2715_v57  ;;  %v1189_v57 = vand.u32 4294901760, %v2906_v29  ;;  %v1184_v42 = vsub.f32 %v2896_v22, %v1183_v48 }
 0x15b   : > { %920 = vmatpush.msra.mxu0 %v2718_v62  ;;  %976 = vmatpush.msra.mxu1 %v2747_v59  ;;  %v2928_v62 = vsub.f32 %v1116_v19, %v2908_v30  ;;  %v1104_v19 = vld [vmem:[#allocation8] sm:$0xff] }
 0x15c   : > { %1031 = vmatpush.msra.mxu2 %v852_v14  ;;  %1080 = vmatpush.msra.mxu3 %v2728_v10  ;;  %v2934_v10 = vand.u32 4294901760, %v1113_v56  ;;  %v2956_v14 = vsub.f32 %v1114_v31, %v2930_v9 }
 0x15d   : > { %923 = vmatpush.msra.mxu0 %v2731_v33  ;;  %978 = vmatpush.msra.mxu1 %v2755_v15  ;;  %v1112_v33 = vld [vmem:[#allocation8 + $0x40] sm:$0xff]  ;;  %v1201_v61 = vand.u32 4294901760, %v2928_v62 }
 0x15e   : > { %1035 = vmatpush.msra.mxu2 %v858_v39  ;;  %1082 = vmatpush.msra.mxu3 %v2738_v47  ;;  %v1195_v47 = vand.u32 4294901760, %v2917_v49  ;;  %v2963_v39 = vsub.f32 %v1113_v56, %v2934_v10 }
 0x15f   : > { %926 = vmatpush.msra.mxu0 %v2741_v51  ;;  %980 = vmatpush.msra.mxu1 %v2768_v44  ;;  %v2944_v51 = vsub.f32 %v1115_v24, %v2919_v50 }
 0x160   : > { %1039 = vmatpush.msra.mxu2 %v864_v20  ;;  %1084 = vmatpush.msra.mxu3 %v2747_v59  ;;  %v1111_v59 = vld [vmem:[#allocation8 + $0x38] sm:$0xff] }
 0x161   : > { %929 = vmatpush.msra.mxu0 %v2750_v60  ;;  %982 = vmatpush.msra.mxu1 %v2778_v21  ;;  %v1190_v60 = vsub.f32 %v2906_v29, %v1189_v57  ;;  %v1207_v20 = vand.u32 4294901760, %v2944_v51 }
 0x162   : > { %1043 = vmatpush.msra.mxu2 %v870_v52  ;;  %1086 = vmatpush.msra.mxu3 %v2755_v15  ;;  %v2958_v15 = vand.u32 4294901760, %v1112_v33  ;;  %v1109_v52 = vld [vmem:[#allocation8 + $0x28] sm:$0xff] }
 0x163   : > { %932 = vmatpush.msra.mxu0 %v2758_v28  ;;  %984 = vmatpush.msra.mxu1 %v2787_v36  ;;  %v1110_v28 = vld [vmem:[#allocation8 + $0x30] sm:$0xff]  ;;  %v1208_v40 = vsub.f32 %v2944_v51, %v1207_v20  ;;  %v2998_v54 = vand.u32 4294901760, %v1109_v52 }
 0x164   : > { %1047 = vmatpush.msra.mxu2 %v876_v1  ;;  %1088 = vmatpush.msra.mxu3 %v2768_v44  ;;  %v1185_v44 = vand.u32 4294901760, %v1184_v42  ;;  %v3473_v1 = vand.u32 4294901760, %v2819_v38  ;;  %v2986_v63 = vsub.f32 %v1112_v33, %v2958_v15  ;;  %v3046_v33 = vand.u32 4294901760, %v1105_v4 }
 0x165   : > { %935 = vmatpush.msra.mxu0 %v2771_v46  ;;  %986 = vmatpush.msra.mxu1 %v2795_v8  ;;  %v1196_v46 = vsub.f32 %v2917_v49, %v1195_v47  ;;  %v1209_v13 = vand.u32 4294901760, %v1208_v40 }
 0x166   : > { %1051 = vmatpush.msra.mxu2 %v882_v41  ;;  %1090 = vmatpush.msra.mxu3 %v2778_v21  ;;  %v2972_v21 = vand.u32 4294901760, %v1111_v59  ;;  %v1202_v41 = vsub.f32 %v2928_v62, %v1201_v61  ;;  %v1225_v16 = vand.u32 4294901760, %v2986_v63 }
 0x167   : > { %938 = vmatpush.msra.mxu0 %v2781_v25  ;;  %988 = vmatpush.msra.mxu1 %v2808_v58  ;;  %v2976_v25 = vand.u32 4294901760, %v1110_v28 }
 0x168   : > { %1055 = vmatpush.msra.mxu2 %v888_v0  ;;  %1092 = vmatpush.msra.mxu3 %v2787_v36  ;;  %v1191_v36 = vand.u32 4294901760, %v1190_v60  ;;  %v1213_v0 = vand.u32 4294901760, %v2956_v14  ;;  %v2996_v53 = vsub.f32 %v1111_v59, %v2972_v21  ;;  %v1249_v60 = vand.u32 4294901760, %v3032_v6 }
 0x169   : > { %992 = vmatmul.f32.vlgmr.msra.gmra.mxu1 %v2842_v55  ;;  %941 = vmatpush.msra.mxu0 %v2790_v45  ;;  %v1219_v45 = vand.u32 4294901760, %v2963_v39  ;;  %v3022_v55 = vand.u32 4294901760, %v1107_v3 }
 0x16a   : > { %1059 = vmatpush.msra.mxu2 %v3473_v1  ;;  %1094 = vmatpush.msra.mxu3 %v2795_v8  ;;  %v1197_v8 = vand.u32 4294901760, %v1196_v46  ;;  %v1214_v32 = vsub.f32 %v2956_v14, %v1213_v0  ;;  %v1231_v26 = vand.u32 4294901760, %v2996_v53  ;;  %v1135_v46 = vld [vmem:[#allocation8 + $0xf8] sm:$0xff] }
 0x16b   : > { %1061 = vmatmul.f32.vlgmr.msra.gmra.mxu2 %v2833_v27  ;;  %944 = vmatpush.msra.mxu0 %v2798_v34  ;;  %v3003_v34 = vsub.f32 %v1110_v28, %v2976_v25  ;;  %v3044_v56 = vsub.f32 %v1107_v3, %v3022_v55  ;;  %v3056_v28 = vsub.f32 %v1106_v43, %v3034_v11 }
 0x16c   : > { %1096 = vmatpush.msra.mxu3 %v2808_v58  ;;  %1186 = vmatpush.msrb.mxu1 %v1185_v44  ;;  %v1203_v58 = vand.u32 4294901760, %v1202_v41  ;;  %v1215_v7 = vand.u32 4294901760, %v1214_v32  ;;  %v1232_v24 = vsub.f32 %v2996_v53, %v1231_v26  ;;  %v3058_v44 = vand.u32 4294901760, %v1104_v19 }
 0x16d   : > { %1098 = vmatmul.f32.vlgmr.msra.gmra.mxu3 %v2833_v27  ;;  %947 = vmatpush.msra.mxu0 %v2811_v2  ;;  %v1220_v2 = vsub.f32 %v2963_v39, %v1219_v45  ;;  %v3020_v27 = vsub.f32 %v1109_v52, %v2998_v54  ;;  %v3068_v41 = vsub.f32 %v1105_v4, %v3046_v33  ;;  %v1261_v40 = vand.u32 4294901760, %v3056_v28 }
 0x16e   : > { %1192 = vmatpush.msrb.mxu1 %v1191_v36  ;;  %1337 = vmatpush.msrb.mxu3 %v2881_v12  ;;  %v1233_v52 = vand.u32 4294901760, %v1232_v24  ;;  %v1255_v36 = vand.u32 4294901760, %v3044_v56  ;;  %v3078_v3 = vsub.f32 %v1104_v19, %v3058_v44 }
 0x16f   : > { %950 = vmatpush.msra.mxu0 %v2819_v38  ;;  %1284 = vmatpush.msrb.mxu2 %v2896_v22  ;;  %v1237_v38 = vand.u32 4294901760, %v3003_v34  ;;  %v1221_v17 = vand.u32 4294901760, %v1220_v2  ;;  %v1243_v31 = vand.u32 4294901760, %v3020_v27  ;;  %v1267_v43 = vand.u32 4294901760, %v3068_v41  ;;  %v1133_v22 = vld [vmem:[#allocation8 + $0xe8] sm:$0xff] }
 0x170   : > { %953 = vmatmul.f32.vlgmr.msra.gmra.mxu0 %v2837_v35  ;;  %1198 = vmatpush.msrb.mxu1 %v1197_v8  ;;  %v1226_v35 = vsub.f32 %v2986_v63, %v1225_v16  ;;  %v1250_v8 = vsub.f32 %v3032_v6, %v1249_v60  ;;  %v1256_v2 = vsub.f32 %v3044_v56, %v1255_v36 }
 0x171   : > { %1339 = vmatpush.msrb.mxu3 %v2888_v18  ;;  %1141 = vmatpush.msrb.mxu0 %v2881_v12  ;;  %v1238_v42 = vsub.f32 %v3003_v34, %v1237_v38  ;;  %v1244_v1 = vsub.f32 %v3020_v27, %v1243_v31  ;;  %v1262_v4 = vsub.f32 %v3056_v28, %v1261_v40 }
 0x172   : > { %1204 = vmatpush.msrb.mxu1 %v1203_v58  ;;  %1287 = vmatpush.msrb.mxu2 %v2906_v29  ;;  %v1227_v59 = vand.u32 4294901760, %v1226_v35  ;;  %v3080_v58 = vand.u32 4294901760, %v1135_v46  ;;  %v1268_v19 = vsub.f32 %v3068_v41, %v1267_v43  ;;  %v3164_v29 = vand.u32 4294901760, %v1133_v22 }
 0x173   : > { %1341 = vmatpush.msrb.mxu3 %v2898_v23  ;;  %1143 = vmatpush.msrb.mxu0 %v2888_v18  ;;  %v1239_v37 = vand.u32 4294901760, %v1238_v42  ;;  %v1245_v32 = vand.u32 4294901760, %v1244_v1  ;;  %v1263_v24 = vand.u32 4294901760, %v1262_v4 }
 0x174   : > { %1210 = vmatpush.msrb.mxu1 %v1209_v13  ;;  %1290 = vmatpush.msrb.mxu2 %v2917_v49  ;;  %v1251_v13 = vand.u32 4294901760, %v1250_v8  ;;  %v3097_v35 = vsub.f32 %v1135_v46, %v3080_v58  ;;  %v1269_v46 = vand.u32 4294901760, %v1268_v19  ;;  %v3172_v49 = vsub.f32 %v1133_v22, %v3164_v29  ;;  %v1124_v19 = vld [vmem:[#allocation8 + $0xa0] sm:$0xff] }
 0x175   : > { %1343 = vmatpush.msrb.mxu3 %v2908_v30  ;;  %1145 = vmatpush.msrb.mxu0 %v2898_v23 }
 0x176   : > { %1216 = vmatpush.msrb.mxu1 %v1215_v7  ;;  %1293 = vmatpush.msrb.mxu2 %v2928_v62  ;;  %v1273_v7 = vand.u32 4294901760, %v3078_v3 }
 0x177   : > { %1345 = vmatpush.msrb.mxu3 %v2919_v50  ;;  %1147 = vmatpush.msrb.mxu0 %v2908_v30 }
 0x178   : > { %1222 = vmatpush.msrb.mxu1 %v1221_v17  ;;  %1296 = vmatpush.msrb.mxu2 %v2944_v51  ;;  %v1257_v17 = vand.u32 4294901760, %v1256_v2  ;;  %v1274_v42 = vsub.f32 %v3078_v3, %v1273_v7  ;;  %v1130_v51 = vld [vmem:[#allocation8 + $0xd0] sm:$0xff]  ;;  %v1125_v2 = vld [vmem:[#allocation8 + $0xa8] sm:$0xff] }
 0x179   : > { %1347 = vmatpush.msrb.mxu3 %v2930_v9  ;;  %1149 = vmatpush.msrb.mxu0 %v2919_v50 }
 0x17a   : > { %1228 = vmatpush.msrb.mxu1 %v1227_v59  ;;  %1299 = vmatpush.msrb.mxu2 %v2956_v14  ;;  %v1524_v59 = vand.u32 4294901760, %v3097_v35 }
 0x17b   : > { %1349 = vmatpush.msrb.mxu3 %v2934_v10  ;;  %1151 = vmatpush.msrb.mxu0 %v2930_v9 }
 0x17c   : > { %1234 = vmatpush.msrb.mxu1 %v1233_v52  ;;  %1302 = vmatpush.msrb.mxu2 %v2963_v39  ;;  %v1275_v52 = vand.u32 4294901760, %v1274_v42  ;;  %v1525_v1 = vsub.f32 %v3097_v35, %v1524_v59  ;;  %v3270_v42 = vand.u32 4294901760, %v1124_v19 }
 0x17d   : > { %1351 = vmatpush.msrb.mxu3 %v2958_v15  ;;  %1153 = vmatpush.msrb.mxu0 %v2934_v10 }
 0x17e   : > { %1240 = vmatpush.msrb.mxu1 %v1239_v37  ;;  %1305 = vmatpush.msrb.mxu2 %v2986_v63  ;;  %v1526_v37 = vand.u32 4294901760, %v1525_v1 }
 0x17f   : > { %1353 = vmatpush.msrb.mxu3 %v2972_v21  ;;  %1155 = vmatpush.msrb.mxu0 %v2958_v15 }
 0x180   : > { %1246 = vmatpush.msrb.mxu1 %v1245_v32  ;;  %1308 = vmatpush.msrb.mxu2 %v2996_v53 }
 0x181   : > { %1355 = vmatpush.msrb.mxu3 %v2976_v25  ;;  %1157 = vmatpush.msrb.mxu0 %v2972_v21 }
 0x182   : > { %1252 = vmatpush.msrb.mxu1 %v1251_v13  ;;  %1311 = vmatpush.msrb.mxu2 %v3003_v34 }
 0x183   : > { %1357 = vmatpush.msrb.mxu3 %v2998_v54  ;;  %1159 = vmatpush.msrb.mxu0 %v2976_v25 }
 0x184   : > { %1258 = vmatpush.msrb.mxu1 %v1257_v17  ;;  %1314 = vmatpush.msrb.mxu2 %v3020_v27  ;;  %v3263_v17 = vand.u32 4294901760, %v1125_v2 }
 0x185   : > { %1359 = vmatpush.msrb.mxu3 %v3010_v5  ;;  %1161 = vmatpush.msrb.mxu0 %v2998_v54 }
 0x186   : > { %1264 = vmatpush.msrb.mxu1 %v1263_v24  ;;  %1317 = vmatpush.msrb.mxu2 %v3032_v6 }
 0x187   : > { %1361 = vmatpush.msrb.mxu3 %v3022_v55  ;;  %1163 = vmatpush.msrb.mxu0 %v3010_v5 }
 0x188   : > { %1270 = vmatpush.msrb.mxu1 %v1269_v46  ;;  %1320 = vmatpush.msrb.mxu2 %v3044_v56  ;;  %v3275_v46 = vsub.f32 %v1125_v2, %v3263_v17 }
 0x189   : > { %1363 = vmatpush.msrb.mxu3 %v3034_v11  ;;  %1165 = vmatpush.msrb.mxu0 %v3022_v55 }
 0x18a   : > { %1276 = vmatpush.msrb.mxu1 %v1275_v52  ;;  %1323 = vmatpush.msrb.mxu2 %v3056_v28  ;;  %v1123_v52 = vld [vmem:[#allocation8 + $0x98] sm:$0xff] }
 0x18b   : > { %1365 = vmatpush.msrb.mxu3 %v3046_v33  ;;  %1167 = vmatpush.msrb.mxu0 %v3034_v11  ;;  %v3284_v22 = vand.u32 4294901760, %v1123_v52 }
 0x18c   : > { %1445 = vmatpush.msra.mxu1 %v2881_v12  ;;  %1326 = vmatpush.msrb.mxu2 %v3068_v41  ;;  %v1134_v12 = vld [vmem:[#allocation8 + $0xf0] sm:$0xff] }
 0x18d   : > { %1367 = vmatpush.msrb.mxu3 %v3058_v44  ;;  %1169 = vmatpush.msrb.mxu0 %v3046_v33 }
 0x18e   : > { %1447 = vmatpush.msra.mxu1 %v2888_v18  ;;  %1329 = vmatpush.msrb.mxu2 %v3078_v3  ;;  %v3156_v18 = vand.u32 4294901760, %v1134_v12  ;;  %v1584_v3 = vand.u32 4294901760, %v3275_v46 }
 0x18f   : > { %1527 = vmatpush.msra.mxu3 %v1526_v37  ;;  %1171 = vmatpush.msrb.mxu0 %v3058_v44 }
 0x190   : > { %1449 = vmatpush.msra.mxu1 %v2898_v23  ;;  %1482 = vmatpush.msra.mxu2 %v3080_v58  ;;  %v3162_v23 = vsub.f32 %v1134_v12, %v3156_v18  ;;  %v3282_v12 = vsub.f32 %v1124_v19, %v3270_v42 }
 0x191   : > { %1378 = vmatpush.msra.mxu0 %v1183_v48 }
 0x192   : > { %1451 = vmatpush.msra.mxu1 %v2908_v30  ;;  %1484 = vmatpush.msra.mxu2 %v3156_v18  ;;  %v1132_v30 = vld [vmem:[#allocation8 + $0xe0] sm:$0xff]  ;;  %v1530_v48 = vand.u32 4294901760, %v3162_v23 }
 0x193   : > { %1382 = vmatpush.msra.mxu0 %v1189_v57  ;;  %v1131_v57 = vld [vmem:[#allocation8 + $0xd8] sm:$0xff] }
 0x194   : > { %1453 = vmatpush.msra.mxu1 %v2919_v50  ;;  %v3174_v50 = vand.u32 4294901760, %v1132_v30  ;;  %1486 = vmatpush.msra.mxu2 %v3164_v29  ;;  %v1531_v62 = vsub.f32 %v3162_v23, %v1530_v48 }
 0x195   : > { %1386 = vmatpush.msra.mxu0 %v1195_v47  ;;  %v3187_v47 = vand.u32 4294901760, %v1131_v57 }
 0x196   : > { %1455 = vmatpush.msra.mxu1 %v2930_v9  ;;  %v1536_v9 = vand.u32 4294901760, %v3172_v49  ;;  %1488 = vmatpush.msra.mxu2 %v3174_v50 }
 0x197   : > { %1390 = vmatpush.msra.mxu0 %v1201_v61  ;;  %v1532_v61 = vand.u32 4294901760, %v1531_v62  ;;  %v3198_v39 = vsub.f32 %v1131_v57, %v3187_v47  ;;  %v1590_v57 = vand.u32 4294901760, %v3282_v12  ;;  %v3290_v62 = vsub.f32 %v1123_v52, %v3284_v22 }
 0x198   : > { %1457 = vmatpush.msra.mxu1 %v2934_v10  ;;  %v3185_v10 = vsub.f32 %v1132_v30, %v3174_v50  ;;  %v1537_v14 = vsub.f32 %v3172_v49, %v1536_v9  ;;  %1490 = vmatpush.msra.mxu2 %v3187_v47 }
 0x199   : > { %1394 = vmatpush.msra.mxu0 %v1207_v20  ;;  %v3202_v20 = vand.u32 4294901760, %v1130_v51  ;;  %1533 = vmatpush.msra.mxu3 %v1532_v61  ;;  %v1548_v63 = vand.u32 4294901760, %v3198_v39  ;;  %v1585_v61 = vsub.f32 %v3275_v46, %v1584_v3 }
 0x19a   : > { %1459 = vmatpush.msra.mxu1 %v2958_v15  ;;  %v1542_v15 = vand.u32 4294901760, %v3185_v10 }
 0x19b   : > { %1398 = vmatpush.msra.mxu0 %v1213_v0  ;;  %v3214_v53 = vsub.f32 %v1130_v51, %v3202_v20  ;;  %1492 = vmatpush.msra.mxu2 %v3202_v20 }
 0x19c   : > { %1461 = vmatpush.msra.mxu1 %v2972_v21  ;;  %v1129_v21 = vld [vmem:[#allocation8 + $0xc8] sm:$0xff]  ;;  %v1543_v0 = vsub.f32 %v3185_v10, %v1542_v15 }
 0x19d   : > { %1402 = vmatpush.msra.mxu0 %v1219_v45  ;;  %v3210_v45 = vand.u32 4294901760, %v1129_v21  ;;  %v1554_v27 = vand.u32 4294901760, %v3214_v53 }
 0x19e   : > { %1463 = vmatpush.msra.mxu1 %v2976_v25  ;;  %v1538_v25 = vand.u32 4294901760, %v1537_v14  ;;  %v1544_v34 = vand.u32 4294901760, %v1543_v0  ;;  %v1121_v14 = vld [vmem:[#allocation8 + $0x88] sm:$0xff] }
 0x19f   : > { %1406 = vmatpush.msra.mxu0 %v1225_v16  ;;  %v1549_v16 = vsub.f32 %v3198_v39, %v1548_v63  ;;  %1494 = vmatpush.msra.mxu2 %v3210_v45 }
 0x1a0   : > { %1465 = vmatpush.msra.mxu1 %v2998_v54  ;;  %v1128_v54 = vld [vmem:[#allocation8 + $0xc0] sm:$0xff]  ;;  %1539 = vmatpush.msra.mxu3 %v1538_v25  ;;  %v1596_v25 = vand.u32 4294901760, %v3290_v62 }
 0x1a1   : > { %1410 = vmatpush.msra.mxu0 %v1231_v26  ;;  %v3225_v26 = vand.u32 4294901760, %v1128_v54 }
 0x1a2   : > { %1467 = vmatpush.msra.mxu1 %v3010_v5  ;;  %v3223_v5 = vsub.f32 %v1129_v21, %v3210_v45  ;;  %1545 = vmatpush.msra.mxu3 %v1544_v34  ;;  %v1591_v21 = vsub.f32 %v3282_v12, %v1590_v57  ;;  %v1586_v34 = vand.u32 4294901760, %v1585_v61 }
 0x1a3   : > { %1414 = vmatpush.msra.mxu0 %v1237_v38  ;;  %v1550_v38 = vand.u32 4294901760, %v1549_v16  ;;  %1496 = vmatpush.msra.mxu2 %v3225_v26  ;;  %v1120_v16 = vld [vmem:[#allocation8 + $0x80] sm:$0xff] }
 0x1a4   : > { %1469 = vmatpush.msra.mxu1 %v3022_v55  ;;  %v1127_v55 = vld [vmem:[#allocation8 + $0xb8] sm:$0xff]  ;;  %v1560_v6 = vand.u32 4294901760, %v3223_v5 }
 0x1a5   : > { %1418 = vmatpush.msra.mxu0 %v1243_v31  ;;  %v3236_v31 = vand.u32 4294901760, %v1127_v55  ;;  %1551 = vmatpush.msra.mxu3 %v1550_v38  ;;  %v1597_v38 = vsub.f32 %v3290_v62, %v1596_v25 }
 0x1a6   : > { %1471 = vmatpush.msra.mxu1 %v3034_v11  ;;  %v3234_v11 = vsub.f32 %v1128_v54, %v3225_v26  ;;  %v1561_v56 = vsub.f32 %v3223_v5, %v1560_v6  ;;  %v3305_v54 = vand.u32 4294901760, %v1121_v14 }
 0x1a7   : > { %1422 = vmatpush.msra.mxu0 %v1249_v60  ;;  %v1126_v60 = vld [vmem:[#allocation8 + $0xb0] sm:$0xff]  ;;  %1498 = vmatpush.msra.mxu2 %v3236_v31 }
 0x1a8   : > { %1473 = vmatpush.msra.mxu1 %v3046_v33  ;;  %v1555_v33 = vsub.f32 %v3214_v53, %v1554_v27  ;;  %v3251_v8 = vand.u32 4294901760, %v1126_v60  ;;  %v1562_v28 = vand.u32 4294901760, %v1561_v56  ;;  %v3315_v56 = vand.u32 4294901760, %v1120_v16 }
 0x1a9   : > { %1426 = vmatpush.msra.mxu0 %v1255_v36  ;;  %v3249_v36 = vsub.f32 %v1127_v55, %v3236_v31  ;;  %v1592_v55 = vand.u32 4294901760, %v1591_v21 }
 0x1aa   : > { %1475 = vmatpush.msra.mxu1 %v3058_v44  ;;  %v1566_v44 = vand.u32 4294901760, %v3234_v11  ;;  %v1556_v32 = vand.u32 4294901760, %v1555_v33  ;;  %v3261_v4 = vsub.f32 %v1126_v60, %v3251_v8  ;;  %1500 = vmatpush.msra.mxu2 %v3251_v8  ;;  %v3313_v60 = vsub.f32 %v1121_v14, %v3305_v54 }
 0x1ab   : > { %1430 = vmatpush.msra.mxu0 %v1261_v40  ;;  %v1572_v13 = vand.u32 4294901760, %v3249_v36 }
 0x1ac   : > { %v1567_v40 = vsub.f32 %v3234_v11, %v1566_v44  ;;  %1557 = vmatpush.msra.mxu3 %v1556_v32  ;;  %1502 = vmatpush.msra.mxu2 %v3263_v17  ;;  %v1598_v32 = vand.u32 4294901760, %v1597_v38 }
 0x1ad   : > { %1434 = vmatpush.msra.mxu0 %v1267_v43  ;;  %v1573_v41 = vsub.f32 %v3249_v36, %v1572_v13  ;;  %v1578_v43 = vand.u32 4294901760, %v3261_v4 }
 0x1ae   : > { %v1568_v24 = vand.u32 4294901760, %v1567_v40  ;;  %1563 = vmatpush.msra.mxu3 %v1562_v28  ;;  %1504 = vmatpush.msra.mxu2 %v3270_v42  ;;  %v3464_v28 = vand.u32 4294901760, %v3313_v60  ;;  %v3323_v40 = vsub.f32 %v1120_v16, %v3315_v56 }
 0x1af   : > { %1438 = vmatpush.msra.mxu0 %v1273_v7  ;;  %v1574_v1 = vand.u32 4294901760, %v1573_v41  ;;  %v1579_v37 = vsub.f32 %v3261_v4, %v1578_v43  ;;  %v1122_v7 = vld [vmem:[#allocation8 + $0x90] sm:$0xff] }
 0x1b0   : > { %1569 = vmatpush.msra.mxu3 %v1568_v24  ;;  %v3292_v51 = vand.u32 4294901760, %v1122_v7  ;;  %1506 = vmatpush.msra.mxu2 %v3284_v22  ;;  %v1609_v24 = vsub.f32 %v3313_v60, %v3464_v28  ;;  %v3463_v41 = vand.u32 4294901760, %v3323_v40 }
 0x1b1   : > { %v1580_v30 = vand.u32 4294901760, %v1579_v37 }
 0x1b2   : > { %1575 = vmatpush.msra.mxu3 %v1574_v1  ;;  %v3303_v0 = vsub.f32 %v1122_v7, %v3292_v51  ;;  %1508 = vmatpush.msra.mxu2 %v3292_v51  ;;  %v1610_v52 = vand.u32 4294901760, %v1609_v24  ;;  %v1615_v1 = vsub.f32 %v3323_v40, %v3463_v41  ;;  %v414_v7 = vld [vmem:[%s3458_s4] sm:$0x3] }
 0x1b4   : > { %1581 = vmatpush.msra.mxu3 %v1580_v30  ;;  %v1602_v33 = vand.u32 4294901760, %v3303_v0  ;;  %1510 = vmatpush.msra.mxu2 %v3305_v54  ;;  %v1616_v37 = vand.u32 4294901760, %v1615_v1  ;;  %v416_v30 = vperm.slane %v414_v7, 0 }
 0x1b6   : > { %1587 = vmatpush.msra.mxu3 %v1586_v34  ;;  %v1603_v2 = vsub.f32 %v3303_v0, %v1602_v33  ;;  %1512 = vmatpush.msra.mxu2 %v3315_v56 }
 0x1b8   : > { %1593 = vmatpush.msra.mxu3 %v1592_v55  ;;  %v1604_v19 = vand.u32 4294901760, %v1603_v2 }
 0x1ba   : > { %1599 = vmatpush.msra.mxu3 %v1598_v32 }
 0x1bc   : > { %1605 = vmatpush.msra.mxu3 %v1604_v19 }
 0x1be   : > { %1611 = vmatpush.msra.mxu3 %v1610_v52 }
 0x1c0   : > { %1617 = vmatpush.msra.mxu3 %v1616_v37 }
 0x1c3   : > { %v559_v21 = vpop.f32.mrf.mxu1 }
 0x1cb   : > { %v458_v61 = vpop.f32.mrf.mxu0  ;;  %v613_v16 = vpop.f32.mrf.mxu2 }
 0x1cc   : > { %v459_v14 = vadd.f32 %v458_v61, %v416_v30  ;;  %v758_v24 = vpop.f32.mrf.mxu1  ;;  %v417_v61 = vperm.slane %v414_v7, 1 }
 0x1cd   : > { %v652_v38 = vpop.f32.mrf.mxu3 }
 0x1ce   : > { %v560_v34 = vadd.f32 %v559_v21, %v459_v14 }
 0x1d0   : > { %v614_v55 = vadd.f32 %v613_v16, %v560_v34 }
 0x1d2   : > { %v653_v32 = vadd.f32 %v652_v38, %v614_v55 }
 0x1d4   : > { %v799_v14 = vpop.f32.mrf.mxu2 }
 0x1d5   : > { %v721_v2 = vpop.f32.mrf.mxu0 }
 0x1d6   : > { %v722_v19 = vadd.f32 %v721_v2, %v653_v32 }
 0x1d8   : > { %v759_v41 = vadd.f32 %v758_v24, %v722_v19 }
 0x1da   : > { %v1102_v52 = vmax.f32 %v759_v41, 0.0 }
 0x1dc   : > { %v1172_v1 = vand.u32 4294901760, %v1102_v52 }
 0x1de   : > { %v1173_v37 = vsub.f32 %v1102_v52, %v1172_v1  ;;  %1278 = vmatmul.f32.vlgmr.msrb.gmra.mxu1 %v1172_v1 }
 0x1df   : > { %1678 = vmatpush.msrb.mxu1 %v3080_v58 }
 0x1e0   : > { %1332 = vmatmul.f32.vlgmr.msrb.gmra.mxu2 %v1173_v37  ;;  %v1174_v28 = vand.u32 4294901760, %v1173_v37 }
 0x1e1   : > { %1680 = vmatpush.msrb.mxu1 %v3156_v18  ;;  %1719 = vmatpush.msrb.mxu2 %v1524_v59  ;;  %v800_v59 = vadd.f32 %v799_v14, %v417_v61 }
 0x1e2   : > { %1371 = vmatmul.f32.vlgmr.msrb.gmra.mxu3 %v1174_v28  ;;  %v1175_v30 = vsub.f32 %v1173_v37, %v1174_v28 }
 0x1e3   : > { %1682 = vmatpush.msrb.mxu1 %v3164_v29  ;;  %1786 = vmatpush.msrb.mxu3 %v3080_v58  ;;  %v900_v58 = vpop.f32.mrf.mxu3 }
 0x1e4   : > { %v1176_v41 = vand.u32 4294901760, %v1175_v30  ;;  %1723 = vmatpush.msrb.mxu2 %v1530_v48 }
 0x1e5   : > { %1684 = vmatpush.msrb.mxu1 %v3174_v50  ;;  %1788 = vmatpush.msrb.mxu3 %v3156_v18 }
 0x1e6   : > { %1177 = vmatmul.f32.vlgmr.msrb.gmra.mxu0 %v1176_v41  ;;  %1477 = vmatmul.f32.vlgmr.msra.gmra.mxu1 %v1172_v1 }
 0x1e7   : > { %1625 = vmatpush.msrb.mxu0 %v3097_v35  ;;  %1686 = vmatpush.msrb.mxu1 %v3187_v47  ;;  %v901_v35 = vadd.f32 %v900_v58, %v800_v59 }
 0x1e8   : > { %1790 = vmatpush.msrb.mxu3 %v3164_v29  ;;  %1727 = vmatpush.msrb.mxu2 %v1536_v9  ;;  %v993_v29 = vpop.f32.mrf.mxu1 }
 0x1e9   : > { %1628 = vmatpush.msrb.mxu0 %v3162_v23  ;;  %1688 = vmatpush.msrb.mxu1 %v3202_v20 }
 0x1ea   : > { %1792 = vmatpush.msrb.mxu3 %v3174_v50  ;;  %1731 = vmatpush.msrb.mxu2 %v1542_v15 }
 0x1eb   : > { %1631 = vmatpush.msrb.mxu0 %v3172_v49  ;;  %1690 = vmatpush.msrb.mxu1 %v3210_v45 }
 0x1ec   : > { %1794 = vmatpush.msrb.mxu3 %v3187_v47  ;;  %1735 = vmatpush.msrb.mxu2 %v1548_v63 }
 0x1ed   : > { %v954_v18 = vpop.f32.mrf.mxu0  ;;  %1634 = vmatpush.msrb.mxu0 %v3185_v10  ;;  %1692 = vmatpush.msrb.mxu1 %v3225_v26 }
 0x1ee   : > { %v955_v23 = vadd.f32 %v954_v18, %v901_v35  ;;  %1796 = vmatpush.msrb.mxu3 %v3202_v20  ;;  %1440 = vmatmul.f32.vlgmr.msra.gmra.mxu0 %v1172_v1  ;;  %v1062_v49 = vpop.f32.mrf.mxu2 }
 0x1ef   : > { %1637 = vmatpush.msrb.mxu0 %v3198_v39  ;;  %1694 = vmatpush.msrb.mxu1 %v3236_v31 }
 0x1f0   : > { %v994_v48 = vadd.f32 %v993_v29, %v955_v23  ;;  %1798 = vmatpush.msrb.mxu3 %v3210_v45  ;;  %1739 = vmatpush.msrb.mxu2 %v1554_v27  ;;  %v1099_v9 = vpop.f32.mrf.mxu3 }
 0x1f1   : > { %1640 = vmatpush.msrb.mxu0 %v3214_v53  ;;  %1696 = vmatpush.msrb.mxu1 %v3251_v8  ;;  %v3474_v53 = vand.u32 4294901760, %v3313_v60 }
 0x1f2   : > { %v1063_v50 = vadd.f32 %v1062_v49, %v994_v48  ;;  %1800 = vmatpush.msrb.mxu3 %v3225_v26  ;;  %1743 = vmatpush.msrb.mxu2 %v1560_v6  ;;  %v2040_v26 = vld [vmem:[%s3460_s6] ss:$0 sm:$0xff] }
 0x1f3   : > { %1643 = vmatpush.msrb.mxu0 %v3223_v5  ;;  %1698 = vmatpush.msrb.mxu1 %v3263_v17  ;;  %v3475_v5 = vand.u32 4294901760, %v3323_v40 }
 0x1f4   : > { %v1100_v10 = vadd.f32 %v1099_v9, %v1063_v50  ;;  %1802 = vmatpush.msrb.mxu3 %v3236_v31  ;;  %1747 = vmatpush.msrb.mxu2 %v1566_v44 }
 0x1f5   : > { %1646 = vmatpush.msrb.mxu0 %v3234_v11  ;;  %1700 = vmatpush.msrb.mxu1 %v3270_v42 }
 0x1f6   : > { %v1103_v47 = vmax.f32 %v1100_v10, 0.0  ;;  %1804 = vmatpush.msrb.mxu3 %v3251_v8  ;;  %1751 = vmatpush.msrb.mxu2 %v1572_v13 }
 0x1f7   : > { %1649 = vmatpush.msrb.mxu0 %v3249_v36  ;;  %1702 = vmatpush.msrb.mxu1 %v3284_v22 }
 0x1f8   : > { %v1513_v15 = vand.u32 4294901760, %v1103_v47  ;;  %1806 = vmatpush.msrb.mxu3 %v3263_v17  ;;  %1755 = vmatpush.msrb.mxu2 %v1578_v43 }
 0x1f9   : > { %1652 = vmatpush.msrb.mxu0 %v3261_v4  ;;  %1704 = vmatpush.msrb.mxu1 %v3292_v51 }
 0x1fa   : > { %v1514_v39 = vsub.f32 %v1103_v47, %v1513_v15  ;;  %1808 = vmatpush.msrb.mxu3 %v3270_v42  ;;  %1759 = vmatpush.msrb.mxu2 %v1584_v3 }
 0x1fb   : > { %1619 = vmatmul.f32.vlgmr.msra.gmra.mxu3 %v1513_v15  ;;  %1655 = vmatpush.msrb.mxu0 %v3275_v46 }
 0x1fc   : > { %v1515_v20 = vand.u32 4294901760, %v1514_v39  ;;  %1706 = vmatpush.msrb.mxu1 %v3305_v54  ;;  %1810 = vmatpush.msrb.mxu3 %v3284_v22 }
 0x1fd   : > { %1658 = vmatpush.msrb.mxu0 %v3282_v12  ;;  %1763 = vmatpush.msrb.mxu2 %v1590_v57 }
 0x1fe   : > { %v1516_v63 = vsub.f32 %v1514_v39, %v1515_v20  ;;  %1708 = vmatpush.msrb.mxu1 %v3315_v56  ;;  %1812 = vmatpush.msrb.mxu3 %v3292_v51 }
 0x1ff   : > { %1712 = vmatmul.f32.vlgmr.msrb.gmra.mxu1 %v1515_v20  ;;  %1661 = vmatpush.msrb.mxu0 %v3290_v62 }
 0x200   : > { %1814 = vmatpush.msrb.mxu3 %v3305_v54  ;;  %v1517_v45 = vand.u32 4294901760, %v1516_v63  ;;  %1767 = vmatpush.msrb.mxu2 %v1596_v25 }
 0x201   : > { %1664 = vmatpush.msrb.mxu0 %v3303_v0 }
 0x202   : > { %1816 = vmatpush.msrb.mxu3 %v3315_v56  ;;  %1518 = vmatmul.f32.vlgmr.msra.gmra.mxu2 %v1517_v45 }
 0x203   : > { %1818 = vmatmul.f32.vlgmr.msrb.gmra.mxu3 %v1513_v15  ;;  %1667 = vmatpush.msrb.mxu0 %v3313_v60 }
 0x204   : > { %1771 = vmatpush.msrb.mxu2 %v1602_v33 }
 0x205   : > { %1670 = vmatpush.msrb.mxu0 %v3323_v40 }
 0x206   : > { %1673 = vmatmul.f32.vlgmr.msrb.gmra.mxu0 %v1514_v39  ;;  %1775 = vmatpush.msrb.mxu2 %v3474_v53 }
 0x208   : > { %1779 = vmatpush.msrb.mxu2 %v3475_v5 }
 0x20a   : > { %1781 = vmatmul.f32.vlgmr.msrb.gmra.mxu2 %v1513_v15 }
 0x25b   : > { %v1279_v11 = vpop.f32.mrf.mxu1 }
 0x263   : > { %v1178_v27 = vpop.f32.mrf.mxu0  ;;  %v1333_v44 = vpop.f32.mrf.mxu2 }
 0x264   : > { %v1179_v6 = vadd.f32 %v2040_v26, %v1178_v27  ;;  %v1478_v43 = vpop.f32.mrf.mxu1 }
 0x265   : > { %v1372_v8 = vpop.f32.mrf.mxu3 }
 0x266   : > { %v1280_v31 = vadd.f32 %v1279_v11, %v1179_v6 }
 0x268   : > { %v1334_v36 = vadd.f32 %v1333_v44, %v1280_v31 }
 0x26a   : > { %v1373_v13 = vadd.f32 %v1372_v8, %v1334_v36 }
 0x26b   : > { %v1441_v4 = vpop.f32.mrf.mxu0 }
 0x26c   : > { %v1442_v17 = vadd.f32 %v1441_v4, %v1373_v13 }
 0x26e   : > { %v1479_v42 = vadd.f32 %v1478_v43, %v1442_v17 }
 0x27c   : > { %v1713_v51 = vpop.f32.mrf.mxu1 }
 0x27e   : > { %v1620_v46 = vpop.f32.mrf.mxu3 }
 0x283   : > { %v1674_v57 = vpop.f32.mrf.mxu0 }
 0x285   : > { %v1519_v12 = vpop.f32.mrf.mxu2 }
 0x286   : > { %v1520_v22 = vadd.f32 %v1519_v12, %v1479_v42  ;;  %v1819_v33 = vpop.f32.mrf.mxu3 }
 0x288   : > { %v1621_v3 = vadd.f32 %v1620_v46, %v1520_v22 }
 0x28a   : > { %v1675_v62 = vadd.f32 %v1674_v57, %v1621_v3 }
 0x28c   : > { %v1714_v25 = vadd.f32 %v1713_v51, %v1675_v62 }
 0x28d   : > { %v1782_v0 = vpop.f32.mrf.mxu2 }
 0x28e   : > { %v1783_v54 = vadd.f32 %v1782_v0, %v1714_v25 }
 0x290   : > { %v1820_v60 = vadd.f32 %v1819_v33, %v1783_v54 }
 0x292   : > { %1822 = vst [vmem:[%s343_s9] sm:$0xff] %v1820_v60 }
 0x293   : > { %2192 = shalt.err (!%p2189_p11)
}
 0x294   : > { %1970 = dma.vmem_to_hbm [thread:$0]  (%p2371_p3), %s1837_s22, 128, %s1839_s1, %s1824_s28  }
 0x295 PF: > { %s1850_s21 = sand.u32 1, %s2227_s24   ;;  %p3476_p12 = scmp.ge.s32.totalorder %s2239_s27, 2 }
 0x296   : > { %s1851_s17 = scalar_lea.sflag [#allocation4], %s1850_s21 }
 0x297   : > { %p1987_p13 = pnand %p3476_p12, %p2324_p6 }
 0x299   : > { %p1988_p0 = pneg %p1987_p13 }
 0x29b   : > { %2222 = dma.done.wait (%p1988_p0), %s1851_s17, 128  }
 0x29c   : > { %2224 = vsyncadd (%p1988_p0), %s1851_s17, 4294967168  ;;  %p22_p5 = scmp.ge.s32.totalorder %s2358_s15, 4   ;;  %s3477_s24 = smov %s2231_s25 }
 0x29d   : > { %s3478_s25 = smov %s2235_s26  ;;  %s3479_s26 = smov %s2367_s19 }
 0x29e   : > { %s3480_s27 = smov %s2358_s15  ;;  %24 = sbr.rel (!%p22_p5) target bundleno = 9 (0x9), region = 105 }
 0x2a3   :  { %1857 = vsyncpa [#allocation3], 1 }
 0x2a4   :  { %1859 = vsyncpa [#allocation3 + $0x1], 1 }
 0x2a5   :  { %1860 = vsyncpa [#allocation6], 1 }
 0x2a6   :  { %1861 = vsyncpa [#allocation9], 1 }
 0x2a7   :  { %1862 = vsyncpa [#allocation4], 1 }
 0x2a8   :  { %1864 = vsyncpa [#allocation4 + $0x1], 1 }

</bundles_post_ra>
